<compile_context>
chip_gen: v6e
topology: v6e:2x2x1
jax: 0.10.0
libtpu: 0.0.40
codegen_flags: <defaults>
</compile_context>

<pallas_src>
import functools
import math

import numpy as np
import jax
import jax.numpy as jnp
from jax.experimental import pallas as pl
from jax.experimental.pallas import tpu as pltpu


# ----------------------------------------------------------------------------
# Pallas kernel: the whole forward pass (single grid point, VMEM-resident).
# NOTE(v7x): single-TensorCore invocation; splitting over both v7x cores would
# need a cross-core BN reduction and is not worth it at this (<1 MiB) size.
# ----------------------------------------------------------------------------
def sonet_kernel(x_ref, wconv_ref, wsp_ref, wdw_ref, wcls_ref,
                 bn1g_ref, bn1b_ref, bn2g_ref, bn2b_ref,
                 sub_ref, logp_ref, mag_scr, *, nb, nf, ns2, tpp, tp):
    bs2 = nb * ns2                 # rows per parity: (batch, pair)
    bs = 2 * bs2                   # B * n_spatial rows
    eps = 1e-5

    # lane-validity mask for the padded time axis (true length tp <= tpp)
    t_idx = jax.lax.broadcasted_iota(jnp.int32, (1, tpp), 1)
    mask = (t_idx < tp).astype(jnp.float32)

    # ---- FIR (Toeplitz) then spatial mix: two f32 MXU dots -----------------
    # temporal FIR on the raw channels: (B*C, T) @ (T, F*TPP)
    xf = jnp.dot(x_ref[...], wconv_ref[...],
                 preferred_element_type=jnp.float32)
    # spatial mix as a block-diagonal dot; output rows ordered (parity, b, j)
    sub = jnp.dot(wsp_ref[...], xf, preferred_element_type=jnp.float32)
    sub_ref[...] = sub             # sub_component output (pre-BN1), lane-dense

    # ---- BN1 stats: two wide column reductions + tiny per-band segment sums
    col_sum = jnp.sum(sub, axis=0, keepdims=True)            # (1, F*TPP)
    col_ssq = jnp.sum(sub * sub, axis=0, keepdims=True)      # padded cols = 0
    inv_cnt1 = 1.0 / float(bs * tp)                           # B*n_spatial*Tp

    # ---- per FIR band: BN1 + pairing + depthwise + magnitude ---------------
    for f in range(nf):
        c0 = f * tpp
        s1 = jnp.sum(col_sum[:, c0:c0 + tpp])
        sq = jnp.sum(col_ssq[:, c0:c0 + tpp])
        mean = s1 * inv_cnt1
        var = sq * inv_cnt1 - mean * mean                     # biased (training)
        scale = jax.lax.rsqrt(var + eps) * bn1g_ref[f]
        shift = bn1b_ref[f] - mean * scale

        sub_f = sub[:, c0:c0 + tpp]                           # live value, no reload
        bn_f = sub_f * scale + shift                          # (B*S, TPP)

        e = bn_f[0:bs2, :]                                    # even spatial rows (b, j)
        o = bn_f[bs2:bs, :]                                   # odd  spatial rows (b, j)
        # pairing coefficients: column (q*2 + h)*F + f, rows (b, j); lane-broadcast
        k00 = (0 * 2 + 0) * nf + f
        k01 = (0 * 2 + 1) * nf + f
        k10 = (1 * 2 + 0) * nf + f
        k11 = (1 * 2 + 1) * nf + f
        a00 = wdw_ref[:, k00:k00 + 1]
        a01 = wdw_ref[:, k01:k01 + 1]
        a10 = wdw_ref[:, k10:k10 + 1]
        a11 = wdw_ref[:, k11:k11 + 1]
        y0 = a00 * e + a01 * o
        y1 = a10 * e + a11 * o
        mag_f = jnp.sqrt(y0 * y0 + y1 * y1) * mask            # (B*S2, TPP), padded -> 0

        # scatter into (PLP, B*TPP) layout: row f*S2 + j, column block per batch
        for b in range(nb):
            mag_scr[f * ns2:(f + 1) * ns2, b * tpp:(b + 1) * tpp] = \
                mag_f[b * ns2:(b + 1) * ns2, :]

    # ---- BN2: batch stats over (B, n_PLP, Tp) -------------------------------
    plp = nf * ns2
    inv_cnt2 = 1.0 / float(nb * plp * tp)
    mag_all = mag_scr[...]                                    # (PLP, B*TPP)
    m1 = jnp.sum(mag_all)
    m2 = jnp.sum(mag_all * mag_all)                           # padded cols masked to 0
    mean2 = m1 * inv_cnt2
    var2 = m2 * inv_cnt2 - mean2 * mean2
    scale2 = jax.lax.rsqrt(var2 + eps) * bn2g_ref[0]
    shift2 = bn2b_ref[0] - mean2 * scale2
    bn2_all = mag_all * scale2 + shift2                       # (PLP, B*TPP)

    # ---- ClassConv + LogSoftmax: ONE dot over all batches -------------------
    logits = jnp.dot(wcls_ref[...], bn2_all,
                     preferred_element_type=jnp.float32)      # (NC, B*TPP)
    mx = jnp.max(logits, axis=0, keepdims=True)
    z = logits - mx
    lse = jnp.log(jnp.sum(jnp.exp(z), axis=0, keepdims=True))
    logp_ref[...] = z - lse                                   # wide lane-dense store


# ----------------------------------------------------------------------------
# Wrapper: jitted, only reshapes / slicing around the pallas_call.
# ----------------------------------------------------------------------------
@functools.partial(jax.jit, static_argnames=("fir_length",))
def sonet_forward(x_nchw, params, fir_length):
    x = jnp.squeeze(x_nchw, axis=1)          # (B, C, T)
    B, C, T = x.shape
    wsp_bd = params["wsp_bd"]                # (B*S, B*C)   block-diagonal spatial mix
    wconv_st = params["wconv_st"]            # (T, F*TPP)   zero-padded FIR Toeplitz
    wdw_bc = params["wdw_bc"]                # (B*S2, 4*F)  pairing coefficients
    wcls = params["wcls"]                    # (NC, n_PLP)  p = f*S2 + j
    F = params["bn1_gamma"].shape[0]
    S = wsp_bd.shape[0] // B
    S2 = S // 2
    NC = wcls.shape[0]
    Tp = T - fir_length + 1
    TPP = wconv_st.shape[1] // F             # lane-padded time axis

    x2d = x.reshape(B * C, T)

    vmem = pl.BlockSpec(memory_space=pltpu.MemorySpace.VMEM)
    smem = pl.BlockSpec(memory_space=pltpu.MemorySpace.SMEM)

    sub_out, logp_out = pl.pallas_call(
        functools.partial(sonet_kernel, nb=B, nf=F, ns2=S2, tpp=TPP, tp=Tp),
        out_shape=(jax.ShapeDtypeStruct((B * S, F * TPP), jnp.float32),
                   jax.ShapeDtypeStruct((NC, B * TPP), jnp.float32)),
        in_specs=[vmem] * 5 + [smem] * 4,
        out_specs=(vmem, vmem),
        scratch_shapes=[pltpu.VMEM((F * S2, B * TPP), jnp.float32)],
    )(x2d, wconv_st, wsp_bd, wdw_bc, wcls,
      params["bn1_gamma"], params["bn1_beta"],
      params["bn2_gamma"], params["bn2_beta"])

    # sub_component: rows (parity, b, j), cols (f, t) -> (B, F, S, Tp)
    sub = sub_out.reshape(2, B, S2, F, TPP)[..., :Tp]
    sub = jnp.transpose(sub, (1, 3, 2, 0, 4)).reshape(B, F, S, Tp)
    # log-probs: (NC, B*TPP) -> (B, NC, Tp)
    logp = jnp.transpose(logp_out.reshape(NC, B, TPP), (1, 0, 2))[:, :, :Tp]
    return logp, sub


# ----------------------------------------------------------------------------
# Deterministic parameter construction (mirrors SONet.__init__ shapes).
# All kernel-side constant plumbing is built HERE, once, in numpy.
# ----------------------------------------------------------------------------
def _xavier_uniform(key, shape):
    # torch conv weight (out, in, kh, kw)
    fan_in = shape[1] * shape[2] * shape[3]
    fan_out = shape[0] * shape[2] * shape[3]
    bound = math.sqrt(6.0 / (fan_in + fan_out))
    return jax.random.uniform(key, shape, jnp.float32, -bound, bound)


def _make_fir(fl, fh, length, fs=250.0):
    # windowed-sinc band-pass (deterministic stand-in for create_filter)
    n = np.arange(length) - (length - 1) / 2.0
    lp = lambda fc: 2.0 * fc / fs * np.sinc(2.0 * fc / fs * n)
    return (lp(fh) - lp(fl)) * np.hamming(length)


def make_params(key, batch, input_channel, n_class, n_spatial, fir_bank,
                fir_length, T):
    B, C, S, L = batch, input_channel, n_spatial, fir_length
    F = len(fir_bank)
    S2 = S // 2
    n_PLP = F * S2
    Tp = T - L + 1
    TPP = ((Tp + 127) // 128) * 128          # lane-dense padded time axis
    k1, k2, k3 = jax.random.split(key, 3)

    # SpatialConv weight (S, 1, C, 1) -> (S, C), then block-diagonal weight
    # with output rows ordered (parity, batch, pair)
    wsp = np.asarray(_xavier_uniform(k1, (S, 1, C, 1))).reshape(S, C)
    wsp_bd = np.zeros((B * S, B * C), np.float32)
    for p in range(2):
        wp = wsp[p::2]                       # (S2, C) filters of this parity
        for b in range(B):
            r0 = p * B * S2 + b * S2
            wsp_bd[r0:r0 + S2, b * C:(b + 1) * C] = wp

    # FIRConv weight (F, 1, 1, L) -> column-stacked, zero-padded Toeplitz
    # matrix (T, F*TPP); column f*TPP + t' implements valid correlation at t'.
    wfir = np.stack([_make_fir(fl, fh, L) for (fl, fh) in fir_bank]
                    ).astype(np.float32)                     # (F, L)
    wconv_st = np.zeros((T, F * TPP), np.float32)
    idx = np.arange(Tp)
    for f in range(F):
        for k in range(L):
            wconv_st[idx + k, f * TPP + idx] = wfir[f, k]

    # DepthwiseConv weight (2*n_PLP, 1, 2, 1) -> (F, S2, 2, 2) [f, j, q, h]
    # -> compact coefficient table (B*S2, 4*F): row b*S2 + j, col (q*2+h)*F + f
    wdw = np.asarray(_xavier_uniform(k2, (2 * n_PLP, 1, 2, 1))
                     ).reshape(F, S2, 2, 2)
    coeff = np.transpose(wdw, (2, 3, 0, 1))                  # (2, 2, F, S2)
    coeff = np.broadcast_to(coeff[:, :, :, None, :], (2, 2, F, B, S2))
    wdw_bc = np.ascontiguousarray(coeff.reshape(4 * F, B * S2).T
                                  ).astype(np.float32)       # (B*S2, 4*F)

    # ClassConv weight (n_class, 1, n_PLP, 1) -> (n_class, n_PLP)
    wcls = np.asarray(_xavier_uniform(k3, (n_class, 1, n_PLP, 1))
                      ).reshape(n_class, n_PLP)

    return {
        "wsp_bd": jnp.asarray(wsp_bd),
        "wconv_st": jnp.asarray(wconv_st),
        "wdw_bc": jnp.asarray(wdw_bc),
        "wcls": jnp.asarray(wcls),
        "bn1_gamma": jnp.ones((F,), jnp.float32),
        "bn1_beta": jnp.zeros((F,), jnp.float32),
        "bn2_gamma": jnp.ones((1,), jnp.float32),
        "bn2_beta": jnp.zeros((1,), jnp.float32),
    }, Tp


if __name__ == "__main__":
    B, C, T = 2, 4, 128
    n_spatial, n_class = 16, 3
    fir_bank = [(4.0, 8.0), (8.0, 13.0), (13.0, 30.0), (30.0, 45.0)]
    fir_length = 51

    key = jax.random.PRNGKey(0)
    kx, kp = jax.random.split(key)
    params, Tp = make_params(kp, B, C, n_class, n_spatial, fir_bank,
                             fir_length, T)

    # module input layout: NCHW = (B, 1, input_channel, T)
    x = jax.random.normal(kx, (B, 1, C, T), jnp.float32)

    logp, sub = sonet_forward(x, params, fir_length=fir_length)
    logp, sub = jax.block_until_ready((logp, sub))

    assert logp.shape == (B, n_class, Tp)
    assert sub.shape == (B, len(fir_bank), n_spatial, Tp)
    # log-softmax sanity: per (b, t) class probabilities sum to ~1
    probs = np.asarray(jnp.exp(logp)).sum(axis=1)
    assert np.allclose(probs, 1.0, atol=1e-2)
    assert np.isfinite(np.asarray(sub)).all()
    assert np.isfinite(np.asarray(logp)).all()

    print("KERNEL_OK")
</pallas_src>

<mosaic_0001>
module attributes {stable_mosaic.version = 11 : i64} {
  func.func @sonet_kernel(%arg0: memref<8x128xf32, #tpu.memory_space<vmem>>, %arg1: memref<128x512xf32, #tpu.memory_space<vmem>>, %arg2: memref<32x8xf32, #tpu.memory_space<vmem>>, %arg3: memref<16x16xf32, #tpu.memory_space<vmem>>, %arg4: memref<3x32xf32, #tpu.memory_space<vmem>>, %arg5: memref<4xf32, #tpu.memory_space<smem>>, %arg6: memref<4xf32, #tpu.memory_space<smem>>, %arg7: memref<1xf32, #tpu.memory_space<smem>>, %arg8: memref<1xf32, #tpu.memory_space<smem>>, %arg9: memref<32x512xf32, #tpu.memory_space<vmem>>, %arg10: memref<3x256xf32, #tpu.memory_space<vmem>>, %arg11: memref<32x256xf32, #tpu.memory_space<vmem>>) attributes {dimension_semantics = [], scalar_prefetch = 0 : i64, scratch_operands = 1 : i64, tpu.core_type = #tpu.core_type<tc>} {
    %0 = tpu.iota {dimensions = array<i32: 1>} : vector<1x128xi32>
    %c78_i32 = arith.constant 78 : i32
    %1 = vector.broadcast %c78_i32 : i32 to vector<1x128xi32>
    %2 = arith.cmpi slt, %0, %1 : vector<1x128xi32>
    %3 = arith.extui %2 : vector<1x128xi1> to vector<1x128xi32>
    %4 = arith.sitofp %3 : vector<1x128xi32> to vector<1x128xf32>
    %c0 = arith.constant 0 : index
    %c0_0 = arith.constant 0 : index
    %5 = vector.load %arg0[%c0, %c0_0] : memref<8x128xf32, #tpu.memory_space<vmem>>, vector<8x128xf32>
    %c0_1 = arith.constant 0 : index
    %c0_2 = arith.constant 0 : index
    %6 = vector.load %arg1[%c0_1, %c0_2] : memref<128x512xf32, #tpu.memory_space<vmem>>, vector<128x512xf32>
    %cst = arith.constant dense<0.000000e+00> : vector<8x512xf32>
    %7 = tpu.matmul %5, %6, %cst {dimension_numbers = #tpu.dot_dimension_numbers<[1], [0], [0], [1], [0, 0, 1, 1], [], []>} : vector<8x128xf32>, vector<128x512xf32>, vector<8x512xf32> -> vector<8x512xf32>
    %c0_3 = arith.constant 0 : index
    %c0_4 = arith.constant 0 : index
    %8 = vector.load %arg2[%c0_3, %c0_4] : memref<32x8xf32, #tpu.memory_space<vmem>>, vector<32x8xf32>
    %cst_5 = arith.constant dense<0.000000e+00> : vector<32x512xf32>
    %9 = tpu.matmul %8, %7, %cst_5 {dimension_numbers = #tpu.dot_dimension_numbers<[1], [0], [0], [1], [0, 0, 1, 1], [], []>} : vector<32x8xf32>, vector<8x512xf32>, vector<32x512xf32> -> vector<32x512xf32>
    %c0_6 = arith.constant 0 : index
    %c0_7 = arith.constant 0 : index
    %10 = vector.load %arg9[%c0_6, %c0_7] : memref<32x512xf32, #tpu.memory_space<vmem>>, vector<32x512xf32>
    tpu.vector_store %arg9[%c0_6, %c0_7], %9 {strides = array<i32>} : memref<32x512xf32, #tpu.memory_space<vmem>>, vector<32x512xf32>,
    %cst_8 = arith.constant dense<0.000000e+00> : vector<512xf32>
    %11 = vector.multi_reduction <add>, %9, %cst_8 [0] : vector<32x512xf32> to vector<512xf32>
    %12 = vector.shape_cast %11 : vector<512xf32> to vector<1x512xf32>
    %13 = arith.mulf %9, %9 : vector<32x512xf32>
    %cst_9 = arith.constant dense<0.000000e+00> : vector<512xf32>
    %14 = vector.multi_reduction <add>, %13, %cst_9 [0] : vector<32x512xf32> to vector<512xf32>
    %15 = vector.shape_cast %14 : vector<512xf32> to vector<1x512xf32>
    %16 = vector.extract_strided_slice %12 {offsets = [0, 0], sizes = [1, 128], strides = [1, 1]} : vector<1x512xf32> to vector<1x128xf32>
    %17 = vector.shape_cast %16 : vector<1x128xf32> to vector<1x1x128xf32>
    %cst_10 = arith.constant dense<0.000000e+00> : vector<1xf32>
    %18 = vector.multi_reduction <add>, %17, %cst_10 [1, 2] : vector<1x1x128xf32> to vector<1xf32>
    %19 = vector.shape_cast %18 : vector<1xf32> to vector<1x1x1xf32>
    %20 = vector.extract %19[0, 0, 0] : f32 from vector<1x1x1xf32>
    %21 = vector.extract_strided_slice %15 {offsets = [0, 0], sizes = [1, 128], strides = [1, 1]} : vector<1x512xf32> to vector<1x128xf32>
    %22 = vector.shape_cast %21 : vector<1x128xf32> to vector<1x1x128xf32>
    %cst_11 = arith.constant dense<0.000000e+00> : vector<1xf32>
    %23 = vector.multi_reduction <add>, %22, %cst_11 [1, 2] : vector<1x1x128xf32> to vector<1xf32>
    %24 = vector.shape_cast %23 : vector<1xf32> to vector<1x1x1xf32>
    %25 = vector.extract %24[0, 0, 0] : f32 from vector<1x1x1xf32>
    %cst_12 = arith.constant 4.00641031E-4 : f32
    %26 = arith.mulf %20, %cst_12 : f32
    %cst_13 = arith.constant 4.00641031E-4 : f32
    %27 = arith.mulf %25, %cst_13 : f32
    %28 = arith.mulf %26, %26 : f32
    %29 = arith.subf %27, %28 : f32
    %cst_14 = arith.constant 9.99999974E-6 : f32
    %30 = arith.addf %29, %cst_14 : f32
    %31 = math.rsqrt %30 : f32
    %c0_15 = arith.constant 0 : index
    %32 = memref.load %arg5[%c0_15] : memref<4xf32, #tpu.memory_space<smem>>
    %33 = arith.mulf %31, %32 : f32
    %c0_16 = arith.constant 0 : index
    %34 = memref.load %arg6[%c0_16] : memref<4xf32, #tpu.memory_space<smem>>
    %35 = arith.mulf %26, %33 : f32
    %36 = arith.subf %34, %35 : f32
    %37 = vector.extract_strided_slice %9 {offsets = [0, 0], sizes = [32, 128], strides = [1, 1]} : vector<32x512xf32> to vector<32x128xf32>
    %38 = vector.broadcast %33 : f32 to vector<32x128xf32>
    %39 = arith.mulf %37, %38 : vector<32x128xf32>
    %40 = vector.broadcast %36 : f32 to vector<32x128xf32>
    %41 = arith.addf %39, %40 : vector<32x128xf32>
    %42 = vector.extract_strided_slice %41 {offsets = [0, 0], sizes = [16, 128], strides = [1, 1]} : vector<32x128xf32> to vector<16x128xf32>
    %43 = vector.extract_strided_slice %41 {offsets = [16, 0], sizes = [16, 128], strides = [1, 1]} : vector<32x128xf32> to vector<16x128xf32>
    %c0_17 = arith.constant 0 : index
    %c0_18 = arith.constant 0 : index
    %44 = vector.load %arg3[%c0_17, %c0_18] : memref<16x16xf32, #tpu.memory_space<vmem>>, vector<16x1xf32>
    %c0_19 = arith.constant 0 : index
    %c4 = arith.constant 4 : index
    %45 = vector.load %arg3[%c0_19, %c4] : memref<16x16xf32, #tpu.memory_space<vmem>>, vector<16x1xf32>
    %c0_20 = arith.constant 0 : index
    %c8 = arith.constant 8 : index
    %46 = vector.load %arg3[%c0_20, %c8] : memref<16x16xf32, #tpu.memory_space<vmem>>, vector<16x1xf32>
    %c0_21 = arith.constant 0 : index
    %c12 = arith.constant 12 : index
    %47 = vector.load %arg3[%c0_21, %c12] : memref<16x16xf32, #tpu.memory_space<vmem>>, vector<16x1xf32>
    %48 = vector.broadcast %44 : vector<16x1xf32> to vector<16x128xf32>
    %49 = arith.mulf %48, %42 : vector<16x128xf32>
    %50 = vector.broadcast %45 : vector<16x1xf32> to vector<16x128xf32>
    %51 = arith.mulf %50, %43 : vector<16x128xf32>
    %52 = arith.addf %49, %51 : vector<16x128xf32>
    %53 = vector.broadcast %46 : vector<16x1xf32> to vector<16x128xf32>
    %54 = arith.mulf %53, %42 : vector<16x128xf32>
    %55 = vector.broadcast %47 : vector<16x1xf32> to vector<16x128xf32>
    %56 = arith.mulf %55, %43 : vector<16x128xf32>
    %57 = arith.addf %54, %56 : vector<16x128xf32>
    %58 = arith.mulf %52, %52 : vector<16x128xf32>
    %59 = arith.mulf %57, %57 : vector<16x128xf32>
    %60 = arith.addf %58, %59 : vector<16x128xf32>
    %61 = math.sqrt %60 : vector<16x128xf32>
    %62 = vector.broadcast %4 : vector<1x128xf32> to vector<16x128xf32>
    %63 = arith.mulf %61, %62 : vector<16x128xf32>
    %64 = vector.extract_strided_slice %63 {offsets = [0, 0], sizes = [8, 128], strides = [1, 1]} : vector<16x128xf32> to vector<8x128xf32>
    %c0_22 = arith.constant 0 : index
    %c0_23 = arith.constant 0 : index
    %65 = vector.load %arg11[%c0_22, %c0_23] : memref<32x256xf32, #tpu.memory_space<vmem>>, vector<8x128xf32>
    tpu.vector_store %arg11[%c0_22, %c0_23], %64 {strides = array<i32>} : memref<32x256xf32, #tpu.memory_space<vmem>>, vector<8x128xf32>,
    %66 = vector.extract_strided_slice %63 {offsets = [8, 0], sizes = [8, 128], strides = [1, 1]} : vector<16x128xf32> to vector<8x128xf32>
    %c0_24 = arith.constant 0 : index
    %c128 = arith.constant 128 : index
    %67 = vector.load %arg11[%c0_24, %c128] : memref<32x256xf32, #tpu.memory_space<vmem>>, vector<8x128xf32>
    tpu.vector_store %arg11[%c0_24, %c128], %66 {strides = array<i32>} : memref<32x256xf32, #tpu.memory_space<vmem>>, vector<8x128xf32>,
    %68 = vector.extract_strided_slice %12 {offsets = [0, 128], sizes = [1, 128], strides = [1, 1]} : vector<1x512xf32> to vector<1x128xf32>
    %69 = vector.shape_cast %68 : vector<1x128xf32> to vector<1x1x128xf32>
    %cst_25 = arith.constant dense<0.000000e+00> : vector<1xf32>
    %70 = vector.multi_reduction <add>, %69, %cst_25 [1, 2] : vector<1x1x128xf32> to vector<1xf32>
    %71 = vector.shape_cast %70 : vector<1xf32> to vector<1x1x1xf32>
    %72 = vector.extract %71[0, 0, 0] : f32 from vector<1x1x1xf32>
    %73 = vector.extract_strided_slice %15 {offsets = [0, 128], sizes = [1, 128], strides = [1, 1]} : vector<1x512xf32> to vector<1x128xf32>
    %74 = vector.shape_cast %73 : vector<1x128xf32> to vector<1x1x128xf32>
    %cst_26 = arith.constant dense<0.000000e+00> : vector<1xf32>
    %75 = vector.multi_reduction <add>, %74, %cst_26 [1, 2] : vector<1x1x128xf32> to vector<1xf32>
    %76 = vector.shape_cast %75 : vector<1xf32> to vector<1x1x1xf32>
    %77 = vector.extract %76[0, 0, 0] : f32 from vector<1x1x1xf32>
    %cst_27 = arith.constant 4.00641031E-4 : f32
    %78 = arith.mulf %72, %cst_27 : f32
    %cst_28 = arith.constant 4.00641031E-4 : f32
    %79 = arith.mulf %77, %cst_28 : f32
    %80 = arith.mulf %78, %78 : f32
    %81 = arith.subf %79, %80 : f32
    %cst_29 = arith.constant 9.99999974E-6 : f32
    %82 = arith.addf %81, %cst_29 : f32
    %83 = math.rsqrt %82 : f32
    %c1 = arith.constant 1 : index
    %84 = memref.load %arg5[%c1] : memref<4xf32, #tpu.memory_space<smem>>
    %85 = arith.mulf %83, %84 : f32
    %c1_30 = arith.constant 1 : index
    %86 = memref.load %arg6[%c1_30] : memref<4xf32, #tpu.memory_space<smem>>
    %87 = arith.mulf %78, %85 : f32
    %88 = arith.subf %86, %87 : f32
    %89 = vector.extract_strided_slice %9 {offsets = [0, 128], sizes = [32, 128], strides = [1, 1]} : vector<32x512xf32> to vector<32x128xf32>
    %90 = vector.broadcast %85 : f32 to vector<32x128xf32>
    %91 = arith.mulf %89, %90 : vector<32x128xf32>
    %92 = vector.broadcast %88 : f32 to vector<32x128xf32>
    %93 = arith.addf %91, %92 : vector<32x128xf32>
    %94 = vector.extract_strided_slice %93 {offsets = [0, 0], sizes = [16, 128], strides = [1, 1]} : vector<32x128xf32> to vector<16x128xf32>
    %95 = vector.extract_strided_slice %93 {offsets = [16, 0], sizes = [16, 128], strides = [1, 1]} : vector<32x128xf32> to vector<16x128xf32>
    %c0_31 = arith.constant 0 : index
    %c1_32 = arith.constant 1 : index
    %96 = vector.load %arg3[%c0_31, %c1_32] : memref<16x16xf32, #tpu.memory_space<vmem>>, vector<16x1xf32>
    %c0_33 = arith.constant 0 : index
    %c5 = arith.constant 5 : index
    %97 = vector.load %arg3[%c0_33, %c5] : memref<16x16xf32, #tpu.memory_space<vmem>>, vector<16x1xf32>
    %c0_34 = arith.constant 0 : index
    %c9 = arith.constant 9 : index
    %98 = vector.load %arg3[%c0_34, %c9] : memref<16x16xf32, #tpu.memory_space<vmem>>, vector<16x1xf32>
    %c0_35 = arith.constant 0 : index
    %c13 = arith.constant 13 : index
    %99 = vector.load %arg3[%c0_35, %c13] : memref<16x16xf32, #tpu.memory_space<vmem>>, vector<16x1xf32>
    %100 = vector.broadcast %96 : vector<16x1xf32> to vector<16x128xf32>
    %101 = arith.mulf %100, %94 : vector<16x128xf32>
    %102 = vector.broadcast %97 : vector<16x1xf32> to vector<16x128xf32>
    %103 = arith.mulf %102, %95 : vector<16x128xf32>
    %104 = arith.addf %101, %103 : vector<16x128xf32>
    %105 = vector.broadcast %98 : vector<16x1xf32> to vector<16x128xf32>
    %106 = arith.mulf %105, %94 : vector<16x128xf32>
    %107 = vector.broadcast %99 : vector<16x1xf32> to vector<16x128xf32>
    %108 = arith.mulf %107, %95 : vector<16x128xf32>
    %109 = arith.addf %106, %108 : vector<16x128xf32>
    %110 = arith.mulf %104, %104 : vector<16x128xf32>
    %111 = arith.mulf %109, %109 : vector<16x128xf32>
    %112 = arith.addf %110, %111 : vector<16x128xf32>
    %113 = math.sqrt %112 : vector<16x128xf32>
    %114 = vector.broadcast %4 : vector<1x128xf32> to vector<16x128xf32>
    %115 = arith.mulf %113, %114 : vector<16x128xf32>
    %116 = vector.extract_strided_slice %115 {offsets = [0, 0], sizes = [8, 128], strides = [1, 1]} : vector<16x128xf32> to vector<8x128xf32>
    %c8_36 = arith.constant 8 : index
    %c0_37 = arith.constant 0 : index
    %117 = vector.load %arg11[%c8_36, %c0_37] : memref<32x256xf32, #tpu.memory_space<vmem>>, vector<8x128xf32>
    tpu.vector_store %arg11[%c8_36, %c0_37], %116 {strides = array<i32>} : memref<32x256xf32, #tpu.memory_space<vmem>>, vector<8x128xf32>,
    %118 = vector.extract_strided_slice %115 {offsets = [8, 0], sizes = [8, 128], strides = [1, 1]} : vector<16x128xf32> to vector<8x128xf32>
    %c8_38 = arith.constant 8 : index
    %c128_39 = arith.constant 128 : index
    %119 = vector.load %arg11[%c8_38, %c128_39] : memref<32x256xf32, #tpu.memory_space<vmem>>, vector<8x128xf32>
    tpu.vector_store %arg11[%c8_38, %c128_39], %118 {strides = array<i32>} : memref<32x256xf32, #tpu.memory_space<vmem>>, vector<8x128xf32>,
    %120 = vector.extract_strided_slice %12 {offsets = [0, 256], sizes = [1, 128], strides = [1, 1]} : vector<1x512xf32> to vector<1x128xf32>
    %121 = vector.shape_cast %120 : vector<1x128xf32> to vector<1x1x128xf32>
    %cst_40 = arith.constant dense<0.000000e+00> : vector<1xf32>
    %122 = vector.multi_reduction <add>, %121, %cst_40 [1, 2] : vector<1x1x128xf32> to vector<1xf32>
    %123 = vector.shape_cast %122 : vector<1xf32> to vector<1x1x1xf32>
    %124 = vector.extract %123[0, 0, 0] : f32 from vector<1x1x1xf32>
    %125 = vector.extract_strided_slice %15 {offsets = [0, 256], sizes = [1, 128], strides = [1, 1]} : vector<1x512xf32> to vector<1x128xf32>
    %126 = vector.shape_cast %125 : vector<1x128xf32> to vector<1x1x128xf32>
    %cst_41 = arith.constant dense<0.000000e+00> : vector<1xf32>
    %127 = vector.multi_reduction <add>, %126, %cst_41 [1, 2] : vector<1x1x128xf32> to vector<1xf32>
    %128 = vector.shape_cast %127 : vector<1xf32> to vector<1x1x1xf32>
    %129 = vector.extract %128[0, 0, 0] : f32 from vector<1x1x1xf32>
    %cst_42 = arith.constant 4.00641031E-4 : f32
    %130 = arith.mulf %124, %cst_42 : f32
    %cst_43 = arith.constant 4.00641031E-4 : f32
    %131 = arith.mulf %129, %cst_43 : f32
    %132 = arith.mulf %130, %130 : f32
    %133 = arith.subf %131, %132 : f32
    %cst_44 = arith.constant 9.99999974E-6 : f32
    %134 = arith.addf %133, %cst_44 : f32
    %135 = math.rsqrt %134 : f32
    %c2 = arith.constant 2 : index
    %136 = memref.load %arg5[%c2] : memref<4xf32, #tpu.memory_space<smem>>
    %137 = arith.mulf %135, %136 : f32
    %c2_45 = arith.constant 2 : index
    %138 = memref.load %arg6[%c2_45] : memref<4xf32, #tpu.memory_space<smem>>
    %139 = arith.mulf %130, %137 : f32
    %140 = arith.subf %138, %139 : f32
    %141 = vector.extract_strided_slice %9 {offsets = [0, 256], sizes = [32, 128], strides = [1, 1]} : vector<32x512xf32> to vector<32x128xf32>
    %142 = vector.broadcast %137 : f32 to vector<32x128xf32>
    %143 = arith.mulf %141, %142 : vector<32x128xf32>
    %144 = vector.broadcast %140 : f32 to vector<32x128xf32>
    %145 = arith.addf %143, %144 : vector<32x128xf32>
    %146 = vector.extract_strided_slice %145 {offsets = [0, 0], sizes = [16, 128], strides = [1, 1]} : vector<32x128xf32> to vector<16x128xf32>
    %147 = vector.extract_strided_slice %145 {offsets = [16, 0], sizes = [16, 128], strides = [1, 1]} : vector<32x128xf32> to vector<16x128xf32>
    %c0_46 = arith.constant 0 : index
    %c2_47 = arith.constant 2 : index
    %148 = vector.load %arg3[%c0_46, %c2_47] : memref<16x16xf32, #tpu.memory_space<vmem>>, vector<16x1xf32>
    %c0_48 = arith.constant 0 : index
    %c6 = arith.constant 6 : index
    %149 = vector.load %arg3[%c0_48, %c6] : memref<16x16xf32, #tpu.memory_space<vmem>>, vector<16x1xf32>
    %c0_49 = arith.constant 0 : index
    %c10 = arith.constant 10 : index
    %150 = vector.load %arg3[%c0_49, %c10] : memref<16x16xf32, #tpu.memory_space<vmem>>, vector<16x1xf32>
    %c0_50 = arith.constant 0 : index
    %c14 = arith.constant 14 : index
    %151 = vector.load %arg3[%c0_50, %c14] : memref<16x16xf32, #tpu.memory_space<vmem>>, vector<16x1xf32>
    %152 = vector.broadcast %148 : vector<16x1xf32> to vector<16x128xf32>
    %153 = arith.mulf %152, %146 : vector<16x128xf32>
    %154 = vector.broadcast %149 : vector<16x1xf32> to vector<16x128xf32>
    %155 = arith.mulf %154, %147 : vector<16x128xf32>
    %156 = arith.addf %153, %155 : vector<16x128xf32>
    %157 = vector.broadcast %150 : vector<16x1xf32> to vector<16x128xf32>
    %158 = arith.mulf %157, %146 : vector<16x128xf32>
    %159 = vector.broadcast %151 : vector<16x1xf32> to vector<16x128xf32>
    %160 = arith.mulf %159, %147 : vector<16x128xf32>
    %161 = arith.addf %158, %160 : vector<16x128xf32>
    %162 = arith.mulf %156, %156 : vector<16x128xf32>
    %163 = arith.mulf %161, %161 : vector<16x128xf32>
    %164 = arith.addf %162, %163 : vector<16x128xf32>
    %165 = math.sqrt %164 : vector<16x128xf32>
    %166 = vector.broadcast %4 : vector<1x128xf32> to vector<16x128xf32>
    %167 = arith.mulf %165, %166 : vector<16x128xf32>
    %168 = vector.extract_strided_slice %167 {offsets = [0, 0], sizes = [8, 128], strides = [1, 1]} : vector<16x128xf32> to vector<8x128xf32>
    %c16 = arith.constant 16 : index
    %c0_51 = arith.constant 0 : index
    %169 = vector.load %arg11[%c16, %c0_51] : memref<32x256xf32, #tpu.memory_space<vmem>>, vector<8x128xf32>
    tpu.vector_store %arg11[%c16, %c0_51], %168 {strides = array<i32>} : memref<32x256xf32, #tpu.memory_space<vmem>>, vector<8x128xf32>,
    %170 = vector.extract_strided_slice %167 {offsets = [8, 0], sizes = [8, 128], strides = [1, 1]} : vector<16x128xf32> to vector<8x128xf32>
    %c16_52 = arith.constant 16 : index
    %c128_53 = arith.constant 128 : index
    %171 = vector.load %arg11[%c16_52, %c128_53] : memref<32x256xf32, #tpu.memory_space<vmem>>, vector<8x128xf32>
    tpu.vector_store %arg11[%c16_52, %c128_53], %170 {strides = array<i32>} : memref<32x256xf32, #tpu.memory_space<vmem>>, vector<8x128xf32>,
    %172 = vector.extract_strided_slice %12 {offsets = [0, 384], sizes = [1, 128], strides = [1, 1]} : vector<1x512xf32> to vector<1x128xf32>
    %173 = vector.shape_cast %172 : vector<1x128xf32> to vector<1x1x128xf32>
    %cst_54 = arith.constant dense<0.000000e+00> : vector<1xf32>
    %174 = vector.multi_reduction <add>, %173, %cst_54 [1, 2] : vector<1x1x128xf32> to vector<1xf32>
    %175 = vector.shape_cast %174 : vector<1xf32> to vector<1x1x1xf32>
    %176 = vector.extract %175[0, 0, 0] : f32 from vector<1x1x1xf32>
    %177 = vector.extract_strided_slice %15 {offsets = [0, 384], sizes = [1, 128], strides = [1, 1]} : vector<1x512xf32> to vector<1x128xf32>
    %178 = vector.shape_cast %177 : vector<1x128xf32> to vector<1x1x128xf32>
    %cst_55 = arith.constant dense<0.000000e+00> : vector<1xf32>
    %179 = vector.multi_reduction <add>, %178, %cst_55 [1, 2] : vector<1x1x128xf32> to vector<1xf32>
    %180 = vector.shape_cast %179 : vector<1xf32> to vector<1x1x1xf32>
    %181 = vector.extract %180[0, 0, 0] : f32 from vector<1x1x1xf32>
    %cst_56 = arith.constant 4.00641031E-4 : f32
    %182 = arith.mulf %176, %cst_56 : f32
    %cst_57 = arith.constant 4.00641031E-4 : f32
    %183 = arith.mulf %181, %cst_57 : f32
    %184 = arith.mulf %182, %182 : f32
    %185 = arith.subf %183, %184 : f32
    %cst_58 = arith.constant 9.99999974E-6 : f32
    %186 = arith.addf %185, %cst_58 : f32
    %187 = math.rsqrt %186 : f32
    %c3 = arith.constant 3 : index
    %188 = memref.load %arg5[%c3] : memref<4xf32, #tpu.memory_space<smem>>
    %189 = arith.mulf %187, %188 : f32
    %c3_59 = arith.constant 3 : index
    %190 = memref.load %arg6[%c3_59] : memref<4xf32, #tpu.memory_space<smem>>
    %191 = arith.mulf %182, %189 : f32
    %192 = arith.subf %190, %191 : f32
    %193 = vector.extract_strided_slice %9 {offsets = [0, 384], sizes = [32, 128], strides = [1, 1]} : vector<32x512xf32> to vector<32x128xf32>
    %194 = vector.broadcast %189 : f32 to vector<32x128xf32>
    %195 = arith.mulf %193, %194 : vector<32x128xf32>
    %196 = vector.broadcast %192 : f32 to vector<32x128xf32>
    %197 = arith.addf %195, %196 : vector<32x128xf32>
    %198 = vector.extract_strided_slice %197 {offsets = [0, 0], sizes = [16, 128], strides = [1, 1]} : vector<32x128xf32> to vector<16x128xf32>
    %199 = vector.extract_strided_slice %197 {offsets = [16, 0], sizes = [16, 128], strides = [1, 1]} : vector<32x128xf32> to vector<16x128xf32>
    %c0_60 = arith.constant 0 : index
    %c3_61 = arith.constant 3 : index
    %200 = vector.load %arg3[%c0_60, %c3_61] : memref<16x16xf32, #tpu.memory_space<vmem>>, vector<16x1xf32>
    %c0_62 = arith.constant 0 : index
    %c7 = arith.constant 7 : index
    %201 = vector.load %arg3[%c0_62, %c7] : memref<16x16xf32, #tpu.memory_space<vmem>>, vector<16x1xf32>
    %c0_63 = arith.constant 0 : index
    %c11 = arith.constant 11 : index
    %202 = vector.load %arg3[%c0_63, %c11] : memref<16x16xf32, #tpu.memory_space<vmem>>, vector<16x1xf32>
    %c0_64 = arith.constant 0 : index
    %c15 = arith.constant 15 : index
    %203 = vector.load %arg3[%c0_64, %c15] : memref<16x16xf32, #tpu.memory_space<vmem>>, vector<16x1xf32>
    %204 = vector.broadcast %200 : vector<16x1xf32> to vector<16x128xf32>
    %205 = arith.mulf %204, %198 : vector<16x128xf32>
    %206 = vector.broadcast %201 : vector<16x1xf32> to vector<16x128xf32>
    %207 = arith.mulf %206, %199 : vector<16x128xf32>
    %208 = arith.addf %205, %207 : vector<16x128xf32>
    %209 = vector.broadcast %202 : vector<16x1xf32> to vector<16x128xf32>
    %210 = arith.mulf %209, %198 : vector<16x128xf32>
    %211 = vector.broadcast %203 : vector<16x1xf32> to vector<16x128xf32>
    %212 = arith.mulf %211, %199 : vector<16x128xf32>
    %213 = arith.addf %210, %212 : vector<16x128xf32>
    %214 = arith.mulf %208, %208 : vector<16x128xf32>
    %215 = arith.mulf %213, %213 : vector<16x128xf32>
    %216 = arith.addf %214, %215 : vector<16x128xf32>
    %217 = math.sqrt %216 : vector<16x128xf32>
    %218 = vector.broadcast %4 : vector<1x128xf32> to vector<16x128xf32>
    %219 = arith.mulf %217, %218 : vector<16x128xf32>
    %220 = vector.extract_strided_slice %219 {offsets = [0, 0], sizes = [8, 128], strides = [1, 1]} : vector<16x128xf32> to vector<8x128xf32>
    %c24 = arith.constant 24 : index
    %c0_65 = arith.constant 0 : index
    %221 = vector.load %arg11[%c24, %c0_65] : memref<32x256xf32, #tpu.memory_space<vmem>>, vector<8x128xf32>
    tpu.vector_store %arg11[%c24, %c0_65], %220 {strides = array<i32>} : memref<32x256xf32, #tpu.memory_space<vmem>>, vector<8x128xf32>,
    %222 = vector.extract_strided_slice %219 {offsets = [8, 0], sizes = [8, 128], strides = [1, 1]} : vector<16x128xf32> to vector<8x128xf32>
    %c24_66 = arith.constant 24 : index
    %c128_67 = arith.constant 128 : index
    %223 = vector.load %arg11[%c24_66, %c128_67] : memref<32x256xf32, #tpu.memory_space<vmem>>, vector<8x128xf32>
    tpu.vector_store %arg11[%c24_66, %c128_67], %222 {strides = array<i32>} : memref<32x256xf32, #tpu.memory_space<vmem>>, vector<8x128xf32>,
    %c0_68 = arith.constant 0 : index
    %c0_69 = arith.constant 0 : index
    %224 = vector.load %arg11[%c0_68, %c0_69] : memref<32x256xf32, #tpu.memory_space<vmem>>, vector<32x256xf32>
    %225 = vector.shape_cast %224 : vector<32x256xf32> to vector<1x32x256xf32>
    %cst_70 = arith.constant dense<0.000000e+00> : vector<1xf32>
    %226 = vector.multi_reduction <add>, %225, %cst_70 [1, 2] : vector<1x32x256xf32> to vector<1xf32>
    %227 = vector.shape_cast %226 : vector<1xf32> to vector<1x1x1xf32>
    %228 = vector.extract %227[0, 0, 0] : f32 from vector<1x1x1xf32>
    %229 = arith.mulf %224, %224 : vector<32x256xf32>
    %230 = vector.shape_cast %229 : vector<32x256xf32> to vector<1x32x256xf32>
    %cst_71 = arith.constant dense<0.000000e+00> : vector<1xf32>
    %231 = vector.multi_reduction <add>, %230, %cst_71 [1, 2] : vector<1x32x256xf32> to vector<1xf32>
    %232 = vector.shape_cast %231 : vector<1xf32> to vector<1x1x1xf32>
    %233 = vector.extract %232[0, 0, 0] : f32 from vector<1x1x1xf32>
    %cst_72 = arith.constant 2.00320515E-4 : f32
    %234 = arith.mulf %228, %cst_72 : f32
    %cst_73 = arith.constant 2.00320515E-4 : f32
    %235 = arith.mulf %233, %cst_73 : f32
    %236 = arith.mulf %234, %234 : f32
    %237 = arith.subf %235, %236 : f32
    %cst_74 = arith.constant 9.99999974E-6 : f32
    %238 = arith.addf %237, %cst_74 : f32
    %239 = math.rsqrt %238 : f32
    %c0_75 = arith.constant 0 : index
    %240 = memref.load %arg7[%c0_75] : memref<1xf32, #tpu.memory_space<smem>>
    %241 = arith.mulf %239, %240 : f32
    %c0_76 = arith.constant 0 : index
    %242 = memref.load %arg8[%c0_76] : memref<1xf32, #tpu.memory_space<smem>>
    %243 = arith.mulf %234, %241 : f32
    %244 = arith.subf %242, %243 : f32
    %245 = vector.broadcast %241 : f32 to vector<32x256xf32>
    %246 = arith.mulf %224, %245 : vector<32x256xf32>
    %247 = vector.broadcast %244 : f32 to vector<32x256xf32>
    %248 = arith.addf %246, %247 : vector<32x256xf32>
    %c0_77 = arith.constant 0 : index
    %c0_78 = arith.constant 0 : index
    %249 = vector.load %arg4[%c0_77, %c0_78] : memref<3x32xf32, #tpu.memory_space<vmem>>, vector<3x32xf32>
    %cst_79 = arith.constant dense<0.000000e+00> : vector<3x256xf32>
    %250 = tpu.matmul %249, %248, %cst_79 {dimension_numbers = #tpu.dot_dimension_numbers<[1], [0], [0], [1], [0, 0, 1, 1], [], []>} : vector<3x32xf32>, vector<32x256xf32>, vector<3x256xf32> -> vector<3x256xf32>
    %cst_80 = arith.constant dense<0xFF800000> : vector<256xf32>
    %251 = vector.multi_reduction <maximumf>, %250, %cst_80 [0] : vector<3x256xf32> to vector<256xf32>
    %252 = vector.shape_cast %251 : vector<256xf32> to vector<1x256xf32>
    %253 = vector.broadcast %252 : vector<1x256xf32> to vector<3x256xf32>
    %254 = arith.subf %250, %253 : vector<3x256xf32>
    %255 = math.exp %254 : vector<3x256xf32>
    %cst_81 = arith.constant dense<0.000000e+00> : vector<256xf32>
    %256 = vector.multi_reduction <add>, %255, %cst_81 [0] : vector<3x256xf32> to vector<256xf32>
    %257 = vector.shape_cast %256 : vector<256xf32> to vector<1x256xf32>
    %258 = math.log %257 : vector<1x256xf32>
    %259 = vector.broadcast %258 : vector<1x256xf32> to vector<3x256xf32>
    %260 = arith.subf %254, %259 : vector<3x256xf32>
    %c0_82 = arith.constant 0 : index
    %c0_83 = arith.constant 0 : index
    %261 = vector.load %arg10[%c0_82, %c0_83] : memref<3x256xf32, #tpu.memory_space<vmem>>, vector<3x256xf32>
    tpu.vector_store %arg10[%c0_82, %c0_83], %260 {strides = array<i32>} : memref<3x256xf32, #tpu.memory_space<vmem>>, vector<3x256xf32>,
    return
  }
}

</mosaic_0001>

<bundles_post_ra>
// kernel: sonet_forward.1
= control target key start
LH: loop header
LB: loop body
LE: loop exit
PB: predicated region body
PF: predicated region fallthrough
CT: control target
= control target key end

     0   :  { %18 = vsyncpa [#allocation6], 0  ;;  %s1936_s0 = inlined_call_operand.vmem [shape: f32[8,128], index: 0, kind: input, shape index: {}]   ;;  %s1937_s1 = inlined_call_operand.hbm [shape: f32[128,512], index: 1, kind: input, shape index: {}]   ;;  %s1938_s2 = inlined_call_operand.vmem [shape: f32[32,8], index: 2, kind: input, shape index: {}]   ;;  %s1939_s3 = inlined_call_operand.vmem [shape: f32[16,16], index: 3, kind: input, shape index: {}]   ;;  %s1940_s4 = inlined_call_operand.vmem [shape: f32[3,32], index: 4, kind: input, shape index: {}]   ;;  %s1941_s5 = inlined_call_operand.vmem [shape: f32[4], index: 5, kind: input, shape index: {}]   ;;  %s1942_s6 = inlined_call_operand.vmem [shape: f32[4], index: 6, kind: input, shape index: {}]   ;;  %s1943_s7 = inlined_call_operand.<no memory space> [shape: f32[1], index: 7, kind: input, shape index: {}]   ;;  %s1944_s8 = inlined_call_operand.<no memory space> [shape: f32[1], index: 8, kind: input, shape index: {}]   ;;  %s1945_s9 = inlined_call_operand.vmem [shape: f32[32,512], index: 9, kind: output, shape index: {0}]   ;;  %s1946_s10 = inlined_call_operand.vmem [shape: f32[3,256], index: 10, kind: output, shape index: {1}]  }
   0x1   :  { %19 = vsyncpa [#allocation7], 0 }
   0x2   :  { %20 = vsyncpa [#allocation10], 0  ;;  %s1441_s13 = smov [#allocation5]   ;;  %s47_s17 = sshll.u32 %s1941_s5, 4  ;;  %s48_s17 = int_to_ptr.vmem [resolvable:$true] %s47_s17 }
   0x3   :  { %s28_s14 = sshll.u32 %s1441_s13, 4  ;;  %s29_s14 = int_to_ptr.vmem [resolvable:$true] %s28_s14 }
   0x4   :  { %s1399_s18 = scalar_lea.vmem %s29_s14, 8192  ;;  %p1404_p1 = scmp.lt.s32.totalorder %s29_s14, %s29_s14 }
   0x5   :  { %p1400_p0 = scmp.ne.s32.totalorder %s29_s14, %s1399_s18  ;;  %p1405_p2 = scmp.lt.s32.totalorder %s1399_s18, %s1399_s18 }
   0x7   :  { %p1406_p3 = por %p1405_p2, %p1404_p1 }
   0x9   :  { %p1407_p4 = pnand %p1406_p3, %p1400_p0 }
   0xb   :  { %1410 = shalt.err (!%p1407_p4)
}
   0xc   :  { %s1442_s19 = smov 512   ;;  %s1443_s20 = smov 32  }
   0xd   :  { %34 = dma.hbm_to_vmem [thread:$0]  %s1937_s1, 8192, %s29_s14, [#allocation6], %s1442_s19, %s1442_s19, %s1443_s20  }
   0xe   :  { %s1411_s23 = scalar_lea.vmem %s48_s17, 16  ;;  %p1416_p6 = scmp.lt.s32.totalorder %s48_s17, %s48_s17 }
   0xf   :  { %p1412_p5 = scmp.ne.s32.totalorder %s48_s17, %s1411_s23  ;;  %p1417_p7 = scmp.lt.s32.totalorder %s1411_s23, %s1411_s23 }
  0x11   :  { %p1418_p8 = por %p1417_p7, %p1416_p6 }
  0x13   :  { %p1419_p9 = pnand %p1418_p8, %p1412_p5 }
  0x15   :  { %1422 = shalt.err (!%p1419_p9)
}
  0x16   :  { %s1444_s5 = smov [#allocation8]   ;;  %s57_s26 = sshll.u32 %s1942_s6, 4  ;;  %s58_s26 = int_to_ptr.vmem [resolvable:$true] %s57_s26 }
  0x17   :  { %50 = dma.vmem_to_smem %s48_s17, 16, %s1444_s5, [#allocation7]  }
  0x18   :  { %s1423_s27 = scalar_lea.vmem %s58_s26, 16  ;;  %p1428_p11 = scmp.lt.s32.totalorder %s58_s26, %s58_s26 }
  0x19   :  { %p1424_p10 = scmp.ne.s32.totalorder %s58_s26, %s1423_s27  ;;  %p1429_p12 = scmp.lt.s32.totalorder %s1423_s27, %s1423_s27 }
  0x1b   :  { %p1430_p13 = por %p1429_p12, %p1428_p11 }
  0x1d   :  { %p1431_p0 = pnand %p1430_p13, %p1424_p10 }
  0x1f   :  { %1434 = shalt.err (!%p1431_p0)
}
  0x20   :  { %s1445_s1 = smov [#allocation9]  }
  0x21   :  { %60 = dma.vmem_to_smem %s58_s26, 16, %s1445_s1, [#allocation10]  }
  0x22   :  { %1435 = dma.done.wait [#allocation6], 8192  }
  0x23   :  { %1436 = vsyncadd [#allocation6], 4294959104 }
  0x24   :  { %1437 = dma.done.wait [#allocation7], 16  }
  0x25   :  { %1438 = vsyncadd [#allocation7], 4294967280 }
  0x26   :  { %1439 = dma.done.wait [#allocation10], 16  }
  0x27   :  { %1440 = vsyncadd [#allocation10], 4294967280 }
  0x28   :  { %74 = sfence }
  0x29   :  { %v142_v0 = vld [vmem:[#allocation5 + $0x1e8] sm:$0xff]  ;;  %v141_v1 = vld [vmem:[#allocation5 + $0x1e0] sm:$0xff]  ;;  %v1446_v4 = vmov 0.0   ;;  %v144_v15 = vld [vmem:[#allocation5 + $0x1f8] sm:$0xff]  ;;  %vm291_vm0 = vcmask 64512   ;;  %vm586_vm1 = vcmask 1040384  }
  0x2a   :  { %v138_v2 = vld [vmem:[#allocation5 + $0x1c8] sm:$0xff]  ;;  %145 = vmatprep.subr.mxu0 %v142_v0  ;;  %v137_v3 = vld [vmem:[#allocation5 + $0x1c0] sm:$0xff]  ;;  %209 = vmatprep.mubr.f32.mxu0 %v1446_v4  ;;  %v143_v16 = vld [vmem:[#allocation5 + $0x1f0] sm:$0xff]  ;;  %s615_s28 = sld [smem:[#allocation8]] }
  0x2b   :  { %146 = vmatpush1.msra.mxu0 %v141_v1  ;;  %v134_v5 = vld [vmem:[#allocation5 + $0x1a8] sm:$0xff]  ;;  %280 = vmatprep.mubr.f32.mxu1 %v1446_v4  ;;  %v133_v6 = vld [vmem:[#allocation5 + $0x1a0] sm:$0xff]  ;;  %v140_v17 = vld [vmem:[#allocation5 + $0x1d8] sm:$0xff] }
  0x2c   :  { %147 = vmatprep.subr.mxu0 %v138_v2  ;;  %v130_v7 = vld [vmem:[#allocation5 + $0x188] sm:$0xff]  ;;  %v129_v8 = vld [vmem:[#allocation5 + $0x180] sm:$0xff]  ;;  %216 = vmatprep.subr.mxu1 %v144_v15  ;;  %v139_v19 = vld [vmem:[#allocation5 + $0x1d0] sm:$0xff] }
  0x2d   :  { %148 = vmatpush1.msra.mxu0 %v137_v3  ;;  %v126_v9 = vld [vmem:[#allocation5 + $0x168] sm:$0xff]  ;;  %v125_v10 = vld [vmem:[#allocation5 + $0x160] sm:$0xff]  ;;  %217 = vmatpush1.msra.mxu1 %v143_v16  ;;  %v136_v21 = vld [vmem:[#allocation5 + $0x1b8] sm:$0xff] }
  0x2e   :  { %149 = vmatprep.subr.mxu0 %v134_v5  ;;  %v122_v11 = vld [vmem:[#allocation5 + $0x148] sm:$0xff]  ;;  %v121_v12 = vld [vmem:[#allocation5 + $0x140] sm:$0xff]  ;;  %218 = vmatprep.subr.mxu1 %v140_v17  ;;  %v135_v23 = vld [vmem:[#allocation5 + $0x1b0] sm:$0xff] }
  0x2f   :  { %150 = vmatpush1.msra.mxu0 %v133_v6  ;;  %v118_v13 = vld [vmem:[#allocation5 + $0x128] sm:$0xff]  ;;  %v117_v14 = vld [vmem:[#allocation5 + $0x120] sm:$0xff]  ;;  %219 = vmatpush1.msra.mxu1 %v139_v19  ;;  %v132_v25 = vld [vmem:[#allocation5 + $0x198] sm:$0xff] }
  0x30   :  { %151 = vmatprep.subr.mxu0 %v130_v7  ;;  %v114_v18 = vld [vmem:[#allocation5 + $0x108] sm:$0xff]  ;;  %v113_v20 = vld [vmem:[#allocation5 + $0x100] sm:$0xff]  ;;  %220 = vmatprep.subr.mxu1 %v136_v21  ;;  %v131_v27 = vld [vmem:[#allocation5 + $0x190] sm:$0xff] }
  0x31   :  { %152 = vmatpush1.msra.mxu0 %v129_v8  ;;  %v110_v22 = vld [vmem:[#allocation5 + $0xe8] sm:$0xff]  ;;  %v109_v24 = vld [vmem:[#allocation5 + $0xe0] sm:$0xff]  ;;  %221 = vmatpush1.msra.mxu1 %v135_v23  ;;  %v128_v29 = vld [vmem:[#allocation5 + $0x178] sm:$0xff] }
  0x32   :  { %153 = vmatprep.subr.mxu0 %v126_v9  ;;  %v106_v26 = vld [vmem:[#allocation5 + $0xc8] sm:$0xff]  ;;  %v105_v28 = vld [vmem:[#allocation5 + $0xc0] sm:$0xff]  ;;  %222 = vmatprep.subr.mxu1 %v132_v25  ;;  %v127_v31 = vld [vmem:[#allocation5 + $0x170] sm:$0xff] }
  0x33   :  { %154 = vmatpush1.msra.mxu0 %v125_v10  ;;  %v102_v30 = vld [vmem:[#allocation5 + $0xa8] sm:$0xff]  ;;  %v101_v32 = vld [vmem:[#allocation5 + $0xa0] sm:$0xff]  ;;  %223 = vmatpush1.msra.mxu1 %v131_v27  ;;  %v124_v33 = vld [vmem:[#allocation5 + $0x158] sm:$0xff] }
  0x34   :  { %155 = vmatprep.subr.mxu0 %v122_v11  ;;  %v98_v34 = vld [vmem:[#allocation5 + $0x88] sm:$0xff]  ;;  %224 = vmatprep.subr.mxu1 %v128_v29  ;;  %v123_v35 = vld [vmem:[#allocation5 + $0x150] sm:$0xff]  ;;  %v97_v36 = vld [vmem:[#allocation5 + $0x80] sm:$0xff]  ;;  %v1447_v11 = vmov 0  }
  0x35   :  { %156 = vmatpush1.msra.mxu0 %v121_v12  ;;  %225 = vmatpush1.msra.mxu1 %v127_v31  ;;  %v120_v37 = vld [vmem:[#allocation5 + $0x138] sm:$0xff]  ;;  %v94_v38 = vld [vmem:[#allocation5 + $0x68] sm:$0xff]  ;;  %v119_v39 = vld [vmem:[#allocation5 + $0x130] sm:$0xff] }
  0x36   :  { %157 = vmatprep.subr.mxu0 %v118_v13  ;;  %226 = vmatprep.subr.mxu1 %v124_v33  ;;  %v93_v40 = vld [vmem:[#allocation5 + $0x60] sm:$0xff]  ;;  %v116_v41 = vld [vmem:[#allocation5 + $0x118] sm:$0xff]  ;;  %v90_v42 = vld [vmem:[#allocation5 + $0x48] sm:$0xff] }
  0x37   :  { %158 = vmatpush1.msra.mxu0 %v117_v14  ;;  %227 = vmatpush1.msra.mxu1 %v123_v35  ;;  %v115_v43 = vld [vmem:[#allocation5 + $0x110] sm:$0xff]  ;;  %v89_v44 = vld [vmem:[#allocation5 + $0x40] sm:$0xff]  ;;  %v112_v45 = vld [vmem:[#allocation5 + $0xf8] sm:$0xff] }
  0x38   :  { %159 = vmatprep.subr.mxu0 %v114_v18  ;;  %228 = vmatprep.subr.mxu1 %v120_v37  ;;  %v86_v46 = vld [vmem:[#allocation5 + $0x28] sm:$0xff]  ;;  %v111_v47 = vld [vmem:[#allocation5 + $0xf0] sm:$0xff]  ;;  %v85_v48 = vld [vmem:[#allocation5 + $0x20] sm:$0xff] }
  0x39   :  { %160 = vmatpush1.msra.mxu0 %v113_v20  ;;  %229 = vmatpush1.msra.mxu1 %v119_v39  ;;  %v108_v49 = vld [vmem:[#allocation5 + $0xd8] sm:$0xff]  ;;  %v82_v50 = vld [vmem:[#allocation5 + $0x8] sm:$0xff]  ;;  %v107_v51 = vld [vmem:[#allocation5 + $0xd0] sm:$0xff] }
  0x3a   :  { %161 = vmatprep.subr.mxu0 %v110_v22  ;;  %230 = vmatprep.subr.mxu1 %v116_v41  ;;  %v81_v52 = vld [vmem:[#allocation5] sm:$0xff]  ;;  %v104_v53 = vld [vmem:[#allocation5 + $0xb8] sm:$0xff]  ;;  %v103_v55 = vld [vmem:[#allocation5 + $0xb0] sm:$0xff] }
  0x3b   :  { %162 = vmatpush1.msra.mxu0 %v109_v24  ;;  %231 = vmatpush1.msra.mxu1 %v115_v43  ;;  %v80_v54 = vld [vmem:[%s1936_s0] sm:$0xff]  ;;  %v100_v56 = vld [vmem:[#allocation5 + $0x98] sm:$0xff]  ;;  %v99_v57 = vld [vmem:[#allocation5 + $0x90] sm:$0xff]  ;;  %s617_s0 = sld [smem:[#allocation9]] }
  0x3c   :  { %163 = vmatprep.subr.mxu0 %v106_v26  ;;  %232 = vmatprep.subr.mxu1 %v112_v45  ;;  %v96_v58 = vld [vmem:[#allocation5 + $0x78] sm:$0xff]  ;;  %v95_v59 = vld [vmem:[#allocation5 + $0x70] sm:$0xff]  ;;  %v287_v5 = vld [vmem:[%s1938_s2] sm:$0xff] }
  0x3d   :  { %164 = vmatpush1.msra.mxu0 %v105_v28  ;;  %233 = vmatpush1.msra.mxu1 %v111_v47  ;;  %v92_v60 = vld [vmem:[#allocation5 + $0x58] sm:$0xff]  ;;  %v91_v61 = vld [vmem:[#allocation5 + $0x50] sm:$0xff]  ;;  %v288_v6 = vld [vmem:[%s1938_s2 + $0x8] sm:$0xff] }
  0x3e   :  { %165 = vmatprep.subr.mxu0 %v102_v30  ;;  %234 = vmatprep.subr.mxu1 %v108_v49  ;;  %v88_v62 = vld [vmem:[#allocation5 + $0x38] sm:$0xff]  ;;  %v87_v63 = vld [vmem:[#allocation5 + $0x30] sm:$0xff] }
  0x3f   :  { %166 = vmatpush1.msra.mxu0 %v101_v32  ;;  %235 = vmatpush1.msra.mxu1 %v107_v51  ;;  %v84_v0 = vld [vmem:[#allocation5 + $0x18] sm:$0xff]  ;;  %v83_v1 = vld [vmem:[#allocation5 + $0x10] sm:$0xff] }
  0x40   :  { %167 = vmatprep.subr.mxu0 %v98_v34  ;;  %236 = vmatprep.subr.mxu1 %v104_v53  ;;  %v289_v7 = vld [vmem:[%s1938_s2 + $0x10] sm:$0xff]  ;;  %v290_v10 = vld [vmem:[%s1938_s2 + $0x18] sm:$0xff] }
  0x41   :  { %168 = vmatpush1.msra.mxu0 %v97_v36  ;;  %237 = vmatpush1.msra.mxu1 %v103_v55 }
  0x42   :  { %169 = vmatprep.subr.mxu0 %v94_v38  ;;  %238 = vmatprep.subr.mxu1 %v100_v56 }
  0x43   :  { %170 = vmatpush1.msra.mxu0 %v93_v40  ;;  %239 = vmatpush1.msra.mxu1 %v99_v57 }
  0x44   :  { %171 = vmatprep.subr.mxu0 %v90_v42  ;;  %240 = vmatprep.subr.mxu1 %v96_v58 }
  0x45   :  { %172 = vmatpush1.msra.mxu0 %v89_v44  ;;  %241 = vmatpush1.msra.mxu1 %v95_v59 }
  0x46   :  { %173 = vmatprep.subr.mxu0 %v86_v46  ;;  %242 = vmatprep.subr.mxu1 %v92_v60 }
  0x47   :  { %174 = vmatpush1.msra.mxu0 %v85_v48  ;;  %243 = vmatpush1.msra.mxu1 %v91_v61 }
  0x48   :  { %175 = vmatprep.subr.mxu0 %v82_v50  ;;  %244 = vmatprep.subr.mxu1 %v88_v62 }
  0x49   :  { %176 = vmatpush1.msra.mxu0 %v81_v52  ;;  %245 = vmatpush1.msra.mxu1 %v87_v63 }
  0x4a   :  { %210 = vmatmul.mubr.f32.vlgmr.msra.gmra.mxu0 %v80_v54  ;;  %246 = vmatprep.subr.mxu1 %v84_v0 }
  0x4b   :  { %368 = vmatprep.mubr.f32.mxu0 %v1446_v4  ;;  %247 = vmatpush1.msra.mxu1 %v83_v1 }
  0x4c   :  { %281 = vmatmul.mubr.f32.vlgmr.msra.gmra.mxu1 %v80_v54  ;;  %1328 = vset.pattern.permute.xlu1 %v1447_v11 }
  0x4d   :  { %457 = vmatprep.mubr.f32.mxu1 %v1446_v4  ;;  %1327 = vset.pattern.permute.xlu0 %v1447_v11 }
 0x10a   :  { %v211_v2 = vpop.f32.mrf.mxu0 }
 0x10c   :  { %v213_v3 = vpop.f32.mrf.mxu0  ;;  %v282_v8 = vpop.f32.mrf.mxu1 }
 0x10d   :  { %334 = vmatprep.subr.mxu0 %v213_v3 }
 0x10e   :  { %335 = vmatpush1.msra.mxu0 %v211_v2  ;;  %v284_v9 = vpop.f32.mrf.mxu1 }
 0x10f   :  { %1260 = vmatmul.mubr.msk.f32.vlgmr.msra.gmra.mxu0 %vm291_vm0, %v287_v5  ;;  %423 = vmatprep.subr.mxu1 %v284_v9 }
 0x110   :  { %374 = vmatprep.mubr.f32.mxu0 %v1446_v4  ;;  %424 = vmatpush1.msra.mxu1 %v282_v8 }
 0x111   :  { %1264 = vmatmul.mubr.msk.f32.vlgmr.msra.gmra.mxu1 %vm291_vm0, %v287_v5 }
 0x112   :  { %463 = vmatprep.mubr.f32.mxu1 %v1446_v4 }
 0x113   :  { %1261 = vmatmul.mubr.msk.f32.gmra.mxu0 %vm291_vm0, %v288_v6 }
 0x114   :  { %380 = vmatprep.mubr.f32.mxu0 %v1446_v4 }
 0x115   :  { %1265 = vmatmul.mubr.msk.f32.gmra.mxu1 %vm291_vm0, %v288_v6 }
 0x116   :  { %469 = vmatprep.mubr.f32.mxu1 %v1446_v4 }
 0x117   :  { %1262 = vmatmul.mubr.msk.f32.gmra.mxu0 %vm291_vm0, %v289_v7 }
 0x118   :  { %386 = vmatprep.mubr.f32.mxu0 %v1446_v4 }
 0x119   :  { %1266 = vmatmul.mubr.msk.f32.gmra.mxu1 %vm291_vm0, %v289_v7 }
 0x11a   :  { %475 = vmatprep.mubr.f32.mxu1 %v1446_v4 }
 0x11b   :  { %1263 = vmatmul.mubr.msk.f32.gmra.mxu0 %vm291_vm0, %v290_v10 }
 0x11c   :  { %1195 = vmatprep.mubr.f32.mxu0 %v1446_v4 }
 0x11d   :  { %1267 = vmatmul.mubr.msk.f32.gmra.mxu1 %vm291_vm0, %v290_v10 }
 0x1cf   :  { %v1561_v12 = vpop.f32.mrf.mxu0 }
 0x1d0   :  { %482 = vst [vmem:[%s1945_s9] sm:$0xff] %v1561_v12  ;;  %v534_v19 = vmul.f32 %v1561_v12, %v1561_v12 }
 0x1d1   :  { %v1567_v13 = vpop.f32.mrf.mxu0  ;;  %v1614_v28 = vpop.f32.mrf.mxu1 }
 0x1d2   :  { %483 = vst [vmem:[%s1945_s9 + $0x8] sm:$0xff] %v1567_v13  ;;  %v535_v22 = vmul.f32 %v1567_v13, %v1567_v13  ;;  %484 = vst [vmem:[%s1945_s9 + $0x10] sm:$0xff] %v1614_v28  ;;  %v536_v38 = vmul.f32 %v1614_v28, %v1614_v28 }
 0x1d3   :  { %v1573_v14 = vpop.f32.mrf.mxu0  ;;  %v1630_v35 = vpop.f32.mrf.mxu1 }
 0x1d4   :  { %486 = vst [vmem:[%s1945_s9 + $0x20] sm:$0xff] %v1573_v14  ;;  %v538_v16 = vmul.f32 %v1573_v14, %v1573_v14  ;;  %v498_v20 = vadd.f32 %v1573_v14, %v1561_v12  ;;  %485 = vst [vmem:[%s1945_s9 + $0x18] sm:$0xff] %v1630_v35  ;;  %v537_v44 = vmul.f32 %v1630_v35, %v1630_v35 }
 0x1d5   :  { %v1579_v15 = vpop.f32.mrf.mxu0  ;;  %v1647_v43 = vpop.f32.mrf.mxu1 }
 0x1d6   :  { %487 = vst [vmem:[%s1945_s9 + $0x28] sm:$0xff] %v1579_v15  ;;  %v539_v17 = vmul.f32 %v1579_v15, %v1579_v15  ;;  %v550_v24 = vadd.f32 %v538_v16, %v534_v19  ;;  %v507_v25 = vadd.f32 %v1579_v15, %v1567_v13  ;;  %488 = vst [vmem:[%s1945_s9 + $0x30] sm:$0xff] %v1647_v43 }
 0x1d7   :  { %v1589_v18 = vpop.f32.mrf.mxu0  ;;  %v516_v45 = vadd.f32 %v1647_v43, %v1614_v28  ;;  %v540_v46 = vmul.f32 %v1647_v43, %v1647_v43  ;;  %v1659_v51 = vpop.f32.mrf.mxu1 }
 0x1d8   :  { %490 = vst [vmem:[%s1945_s9 + $0x40] sm:$0xff] %v1589_v18  ;;  %v542_v21 = vmul.f32 %v1589_v18, %v1589_v18  ;;  %v499_v26 = vadd.f32 %v498_v20, %v1589_v18  ;;  %v559_v29 = vadd.f32 %v539_v17, %v535_v22  ;;  %489 = vst [vmem:[%s1945_s9 + $0x38] sm:$0xff] %v1659_v51 }
 0x1d9   :  { %v1603_v23 = vpop.f32.mrf.mxu0  ;;  %v568_v52 = vadd.f32 %v540_v46, %v536_v38  ;;  %v525_v53 = vadd.f32 %v1659_v51, %v1630_v35  ;;  %v541_v54 = vmul.f32 %v1659_v51, %v1659_v51  ;;  %v1669_v59 = vpop.f32.mrf.mxu1 }
 0x1da   :  { %491 = vst [vmem:[%s1945_s9 + $0x48] sm:$0xff] %v1603_v23  ;;  %v543_v27 = vmul.f32 %v1603_v23, %v1603_v23  ;;  %v551_v31 = vadd.f32 %v550_v24, %v542_v21  ;;  %v508_v32 = vadd.f32 %v507_v25, %v1603_v23  ;;  %492 = vst [vmem:[%s1945_s9 + $0x50] sm:$0xff] %v1669_v59 }
 0x1db   :  { %v1616_v30 = vpop.f32.mrf.mxu0  ;;  %v577_v60 = vadd.f32 %v541_v54, %v537_v44  ;;  %v517_v61 = vadd.f32 %v516_v45, %v1669_v59  ;;  %v544_v62 = vmul.f32 %v1669_v59, %v1669_v59  ;;  %v1678_v3 = vpop.f32.mrf.mxu1 }
 0x1dc   :  { %494 = vst [vmem:[%s1945_s9 + $0x60] sm:$0xff] %v1616_v30  ;;  %v500_v33 = vadd.f32 %v499_v26, %v1616_v30  ;;  %v546_v34 = vmul.f32 %v1616_v30, %v1616_v30  ;;  %v560_v36 = vadd.f32 %v559_v29, %v543_v27  ;;  %493 = vst [vmem:[%s1945_s9 + $0x58] sm:$0xff] %v1678_v3 }
 0x1dd   :  { %v1632_v37 = vpop.f32.mrf.mxu0  ;;  %v569_v5 = vadd.f32 %v568_v52, %v544_v62  ;;  %v545_v6 = vmul.f32 %v1678_v3, %v1678_v3  ;;  %v526_v7 = vadd.f32 %v525_v53, %v1678_v3  ;;  %v1687_v16 = vpop.f32.mrf.mxu1 }
 0x1de   :  { %v552_v39 = vadd.f32 %v551_v31, %v546_v34  ;;  %495 = vst [vmem:[%s1945_s9 + $0x68] sm:$0xff] %v1632_v37  ;;  %v509_v40 = vadd.f32 %v508_v32, %v1632_v37  ;;  %v547_v41 = vmul.f32 %v1632_v37, %v1632_v37  ;;  %v501_v42 = vrot.slane %v500_v33, 4  ;;  %496 = vst [vmem:[%s1945_s9 + $0x70] sm:$0xff] %v1687_v16 }
 0x1df   :  { %v518_v17 = vadd.f32 %v517_v61, %v1687_v16  ;;  %v548_v19 = vmul.f32 %v1687_v16, %v1687_v16  ;;  %v578_v20 = vadd.f32 %v577_v60, %v545_v6  ;;  %v1696_v26 = vpop.f32.mrf.mxu1 }
 0x1e0   :  { %v561_v47 = vadd.f32 %v560_v36, %v547_v41  ;;  %v502_v48 = vadd.f32 %v501_v42, %v500_v33  ;;  %v510_v49 = vrot.slane %v509_v40, 4  ;;  %v553_v50 = vrot.slane %v552_v39, 4  ;;  %497 = vst [vmem:[%s1945_s9 + $0x78] sm:$0xff] %v1696_v26 }
 0x1e1   :  { %v519_v27 = vrot.slane %v518_v17, 4  ;;  %v570_v29 = vadd.f32 %v569_v5, %v548_v19  ;;  %v527_v31 = vadd.f32 %v526_v7, %v1696_v26  ;;  %v549_v32 = vmul.f32 %v1696_v26, %v1696_v26  ;;  %v1722_v19 = vld [vmem:[%s1939_s3] sm:$0xff] }
 0x1e2   :  { %v503_v55 = vrot.slane %v502_v48, 2  ;;  %v511_v56 = vadd.f32 %v510_v49, %v509_v40  ;;  %v554_v57 = vadd.f32 %v553_v50, %v552_v39  ;;  %v562_v58 = vrot.slane %v561_v47, 4 }
 0x1e3   :  { %v528_v39 = vrot.slane %v527_v31, 4  ;;  %v579_v40 = vadd.f32 %v578_v20, %v549_v32  ;;  %v571_v41 = vrot.slane %v570_v29, 4  ;;  %v520_v42 = vadd.f32 %v519_v27, %v518_v17  ;;  %v1716_v17 = vld [vmem:[%s1939_s3 + $0x8] sm:$0xff] }
 0x1e4   :  { %v504_v63 = vadd.f32 %v503_v55, %v502_v48  ;;  %v512_v0 = vrot.slane %v511_v56, 2  ;;  %v555_v1 = vrot.slane %v554_v57, 2  ;;  %v563_v2 = vadd.f32 %v562_v58, %v561_v47 }
 0x1e5   :  { %v529_v46 = vadd.f32 %v528_v39, %v527_v31  ;;  %v580_v47 = vrot.slane %v579_v40, 4  ;;  %v572_v48 = vadd.f32 %v571_v41, %v570_v29  ;;  %v521_v49 = vrot.slane %v520_v42, 2 }
 0x1e6   :  { %v505_v8 = vrot.slane %v504_v63, 1  ;;  %v513_v9 = vadd.f32 %v512_v0, %v511_v56  ;;  %v556_v10 = vadd.f32 %v555_v1, %v554_v57  ;;  %v564_v11 = vrot.slane %v563_v2, 2 }
 0x1e7   :  { %v573_v52 = vrot.slane %v572_v48, 2  ;;  %v581_v53 = vadd.f32 %v580_v47, %v579_v40  ;;  %v522_v54 = vadd.f32 %v521_v49, %v520_v42  ;;  %v530_v55 = vrot.slane %v529_v46, 2 }
 0x1e8   :  { %v506_v21 = vadd.f32 %v505_v8, %v504_v63  ;;  %v514_v22 = vrot.slane %v513_v9, 1  ;;  %v557_v24 = vrot.slane %v556_v10, 1  ;;  %v565_v25 = vadd.f32 %v564_v11, %v563_v2 }
 0x1e9   :  { %v574_v57 = vadd.f32 %v573_v52, %v572_v48  ;;  %v582_v58 = vrot.slane %v581_v53, 2  ;;  %v523_v60 = vrot.slane %v522_v54, 1  ;;  %v531_v61 = vadd.f32 %v530_v55, %v529_v46 }
 0x1ea   :  { %v587_v33 = vsel %vm586_vm1, %v506_v21, 0.0  ;;  %v515_v34 = vadd.f32 %v514_v22, %v513_v9  ;;  %v558_v36 = vadd.f32 %v557_v24, %v556_v10  ;;  %v566_v38 = vrot.slane %v565_v25, 1 }
 0x1eb   :  { %588 = vadd.xlane.f32.xlu0 %v587_v33  ;;  %v575_v62 = vrot.slane %v574_v57, 1  ;;  %v583_v63 = vadd.f32 %v582_v58, %v581_v53  ;;  %v524_v0 = vadd.f32 %v523_v60, %v522_v54  ;;  %v532_v1 = vrot.slane %v531_v61, 1 }
 0x1ec   :  { %v702_v44 = vsel %vm586_vm1, %v515_v34, 0.0  ;;  %v567_v45 = vadd.f32 %v566_v38, %v565_v25  ;;  %v597_v50 = vsel %vm586_vm1, %v558_v36, 0.0  ;;  %v1448_v20 = vmov 4  }
 0x1ed   :  { %703 = vadd.xlane.f32.xlu1 %v702_v44  ;;  %v576_v2 = vadd.f32 %v575_v62, %v574_v57  ;;  %v584_v5 = vrot.slane %v583_v63, 1  ;;  %v817_v6 = vsel %vm586_vm1, %v524_v0, 0.0  ;;  %v533_v7 = vadd.f32 %v532_v1, %v531_v61 }
 0x1ee   :  { %v712_v56 = vsel %vm586_vm1, %v567_v45, 0.0  ;;  %v1449_v21 = vmov 8   ;;  %v1450_v22 = vmov 12   ;;  %v1451_v24 = vmov 1  }
 0x1ef   :  { %598 = vadd.xlane.f32.xlu0 %v597_v50  ;;  %v827_v8 = vsel %vm586_vm1, %v576_v2, 0.0  ;;  %v585_v9 = vadd.f32 %v584_v5, %v583_v63  ;;  %v932_v10 = vsel %vm586_vm1, %v533_v7, 0.0  ;;  %v1452_v25 = vmov 5  }
 0x1f0   :  { %v1453_v27 = vmov 9   ;;  %v1454_v29 = vmov 13   ;;  %v1455_v48 = vmov 2   ;;  %v1456_v49 = vmov 6  }
 0x1f1   :  { %713 = vadd.xlane.f32.xlu1 %v712_v56  ;;  %v942_v11 = vsel %vm586_vm1, %v585_v9, 0.0  ;;  %v1457_v50 = vmov 14   ;;  %v1458_v52 = vmov 10  }
 0x1f3   :  { %818 = vadd.xlane.f32.xlu0 %v817_v6 }
 0x1f5   :  { %828 = vadd.xlane.f32.xlu1 %v827_v8  ;;  %v1459_v8 = vmov 7  }
 0x1f7   :  { %933 = vadd.xlane.f32.xlu0 %v932_v10  ;;  %v1460_v10 = vmov 11  }
 0x1f9   :  { %943 = vadd.xlane.f32.xlu1 %v942_v11  ;;  %v1461_v11 = vmov 3  }
 0x20a   :  { %639 = vperm.xlu1 %1328, %v1716_v17  }
 0x20d   :  { %634 = vperm.xlu0 %1327, %v1722_v19  }
 0x20e   :  { %1329 = vset.pattern.permute.xlu1 %v1448_v20 }
 0x20f   :  { %645 = vperm.xlu1 %1329, %v1722_v19  }
 0x211   :  { %1333 = vset.pattern.permute.xlu0 %v1452_v25 }
 0x212   :  { %760 = vperm.xlu0 %1333, %v1722_v19  }
 0x213   :  { %649 = vperm.xlu1 %1329, %v1716_v17  }
 0x216   :  { %1336 = vset.pattern.permute.xlu0 %v1451_v24 }
 0x217   :  { %1330 = vset.pattern.permute.xlu1 %v1449_v21  ;;  %754 = vperm.xlu0 %1336, %v1716_v17   ;;  %v1462_v21 = vmov 15  }
 0x218   :  { %657 = vperm.xlu1 %1330, %v1722_v19  }
 0x21b   :  { %1339 = vset.pattern.permute.xlu0 %v1454_v29 }
 0x21c   :  { %661 = vperm.xlu1 %1330, %v1716_v17   ;;  %786 = vperm.xlu0 %1339, %v1716_v17  }
 0x220   :  { %1331 = vset.pattern.permute.xlu1 %v1450_v22  ;;  %1342 = vset.pattern.permute.xlu0 %v1458_v52 }
 0x221   :  { %667 = vperm.xlu1 %1331, %v1722_v19   ;;  %887 = vperm.xlu0 %1342, %v1722_v19  }
 0x225   :  { %671 = vperm.xlu1 %1331, %v1716_v17   ;;  %1345 = vset.pattern.permute.xlu0 %v1456_v49 }
 0x226   :  { %879 = vperm.xlu0 %1345, %v1716_v17  }
 0x229   :  { %1332 = vset.pattern.permute.xlu1 %v1451_v24 }
 0x22a   :  { %749 = vperm.xlu1 %1332, %v1722_v19   ;;  %1348 = vset.pattern.permute.xlu0 %v1461_v11 }
 0x22b   :  { %979 = vperm.xlu0 %1348, %v1722_v19  }
 0x22e   :  { %1334 = vset.pattern.permute.xlu1 %v1453_v27 }
 0x22f   :  { %772 = vperm.xlu1 %1334, %v1722_v19   ;;  %1351 = vset.pattern.permute.xlu0 %v1462_v21 }
 0x230   :  { %1012 = vperm.xlu0 %1351, %v1722_v19  }
 0x233   :  { %1335 = vset.pattern.permute.xlu1 %v1454_v29 }
 0x234   :  { %782 = vperm.xlu1 %1335, %v1722_v19   ;;  %1354 = vset.pattern.permute.xlu0 %v1460_v10 }
 0x235   :  { %1006 = vperm.xlu0 %1354, %v1716_v17  }
 0x238   :  { %1337 = vset.pattern.permute.xlu1 %v1452_v25 }
 0x239   :  { %764 = vperm.xlu1 %1337, %v1716_v17   ;;  %1356 = vset.pattern.permute.xlu0 %v1462_v21 }
 0x23d   :  { %1338 = vset.pattern.permute.xlu1 %v1453_v27 }
 0x23e   :  { %776 = vperm.xlu1 %1338, %v1716_v17  }
 0x242   :  { %1340 = vset.pattern.permute.xlu1 %v1455_v48 }
 0x243   :  { %864 = vperm.xlu1 %1340, %v1722_v19  }
 0x247   :  { %1341 = vset.pattern.permute.xlu1 %v1456_v49 }
 0x248   :  { %875 = vperm.xlu1 %1341, %v1722_v19  }
 0x24c   :  { %1343 = vset.pattern.permute.xlu1 %v1457_v50 }
 0x24d   :  { %897 = vperm.xlu1 %1343, %v1722_v19  }
 0x251   :  { %1344 = vset.pattern.permute.xlu1 %v1455_v48 }
 0x252   :  { %869 = vperm.xlu1 %1344, %v1716_v17  }
 0x256   :  { %1346 = vset.pattern.permute.xlu1 %v1458_v52 }
 0x257   :  { %891 = vperm.xlu1 %1346, %v1716_v17  }
 0x25b   :  { %1347 = vset.pattern.permute.xlu1 %v1457_v50 }
 0x25c   :  { %901 = vperm.xlu1 %1347, %v1716_v17  }
 0x260   :  { %1349 = vset.pattern.permute.xlu1 %v1459_v8 }
 0x261   :  { %990 = vperm.xlu1 %1349, %v1722_v19  }
 0x265   :  { %1350 = vset.pattern.permute.xlu1 %v1460_v10 }
 0x266   :  { %1002 = vperm.xlu1 %1350, %v1722_v19  }
 0x26a   :  { %1352 = vset.pattern.permute.xlu1 %v1461_v11 }
 0x26b   :  { %984 = vperm.xlu1 %1352, %v1716_v17  }
 0x26f   :  { %1353 = vset.pattern.permute.xlu1 %v1459_v8 }
 0x270   :  { %994 = vperm.xlu1 %1353, %v1716_v17  }
 0x274   :  { %v589_v31 = vpop.xlane.xlu0 %588  ;;  %1355 = vset.pattern.permute.xlu1 %v1462_v21 }
 0x275   :  { %v590_v32 = vrot.slane %v589_v31, 4  ;;  %1016 = vperm.xlu1 %1355, %v1716_v17  }
 0x276   :  { %v704_v53 = vpop.xlane.xlu1 %703 }
 0x277   :  { %v591_v33 = vadd.f32 %v590_v32, %v589_v31  ;;  %v705_v55 = vrot.slane %v704_v53, 4 }
 0x278   :  { %v599_v34 = vpop.xlane.xlu0 %598 }
 0x279   :  { %v592_v36 = vrot.slane %v591_v33, 2  ;;  %v600_v38 = vrot.slane %v599_v34, 4  ;;  %v706_v57 = vadd.f32 %v705_v55, %v704_v53 }
 0x27a   :  { %v714_v54 = vpop.xlane.xlu1 %713 }
 0x27b   :  { %v601_v39 = vadd.f32 %v600_v38, %v599_v34  ;;  %v593_v40 = vadd.f32 %v592_v36, %v591_v33  ;;  %v715_v56 = vrot.slane %v714_v54, 4  ;;  %v707_v61 = vrot.slane %v706_v57, 2 }
 0x27c   :  { %v819_v29 = vpop.xlane.xlu0 %818 }
 0x27d   :  { %v602_v41 = vrot.slane %v601_v39, 2  ;;  %v594_v42 = vrot.slane %v593_v40, 1  ;;  %v716_v58 = vadd.f32 %v715_v56, %v714_v54  ;;  %v708_v63 = vadd.f32 %v707_v61, %v706_v57 }
 0x27e   :  { %v829_v9 = vpop.xlane.xlu1 %828  ;;  %v820_v32 = vrot.slane %v819_v29, 4 }
 0x27f   :  { %v595_v44 = vadd.f32 %v594_v42, %v593_v40  ;;  %v603_v45 = vadd.f32 %v602_v41, %v601_v39  ;;  %v717_v62 = vrot.slane %v716_v58, 2  ;;  %v709_v1 = vrot.slane %v708_v63, 1 }
 0x280   :  { %v934_v17 = vpop.xlane.xlu0 %933  ;;  %v830_v33 = vrot.slane %v829_v9, 4  ;;  %v821_v42 = vadd.f32 %v820_v32, %v819_v29 }
 0x281   :  { %1275 = vpush %v595_v44  ;;  %v604_v46 = vrot.slane %v603_v45, 1  ;;  %v718_v0 = vadd.f32 %v717_v62, %v716_v58  ;;  %v710_v6 = vadd.f32 %v709_v1, %v708_v63  ;;  %v935_v1 = vrot.slane %v934_v17, 4 }
 0x282   :  { %v1753_v20 = vpop.xlane.xlu1 %943 }
 0x283   :  { %v605_v47 = vadd.f32 %v604_v46, %v603_v45  ;;  %v719_v2 = vrot.slane %v718_v0, 1  ;;  %v831_v45 = vadd.f32 %v830_v33, %v829_v9 }
 0x285   :  { %1277 = vpush %v605_v47  ;;  %v720_v7 = vadd.f32 %v719_v2, %v718_v0  ;;  %v832_v53 = vrot.slane %v831_v45, 2  ;;  %v945_v2 = vrot.slane %v1753_v20, 4 }
 0x286   :  { %v1759_v22 = vpop.permute.xlu1 %639 }
 0x287   :  { %v833_v58 = vadd.f32 %v832_v53, %v831_v45 }
 0x288   :  { %v635_v41 = vpop.permute.xlu0 %634 }
 0x289   :  { %v834_v61 = vrot.slane %v833_v58, 1 }
 0x28a   :  { %v646_v24 = vpop.permute.xlu1 %645 }
 0x28b   :  { %v835_v0 = vadd.f32 %v834_v61, %v833_v58 }
 0x28e   :  { %v1763_v25 = vpop.permute.xlu1 %649 }
 0x293   :  { %v658_v27 = vpop.permute.xlu1 %657 }
 0x297   :  { %v1770_v31 = vpop.permute.xlu1 %661 }
 0x29c   :  { %v668_v44 = vpop.permute.xlu1 %667 }
 0x2a0   :  { %v672_v33 = vpop.permute.xlu1 %671 }
 0x2b2   :  { %s1276_s3 = spop %1275 }
 0x2b3   :  { %s1747_s24 = smul.f32 0.00040064103, %s1276_s3 }
 0x2b5   :  { %s609_s25 = smul.f32 %s1747_s24, %s1747_s24 }
 0x2b6   :  { %s1278_s26 = spop %1277 }
 0x2b7   :  { %s608_s27 = smul.f32 0.00040064103, %s1278_s26 }
 0x2b9   :  { %s610_s1 = ssub.f32 %s608_s27, %s609_s25 }
 0x2bb   :  { %s611_s6 = sadd.f32 1e-05, %s610_s1 }
 0x2bd   :  { %v612_v60 = vstv %s611_s6 }
 0x2be   :  { %1357 = vrsqrt.f32 %v612_v60 }
 0x2cb   :  { %v1358_v5 = vpop.eup %1357 }
 0x2cc   :  { %1279 = vpush %v1358_v5  ;;  %v936_v5 = vadd.f32 %v935_v1, %v934_v17 }
 0x2cd   :  { %1281 = vpush %v710_v6  ;;  %v946_v6 = vadd.f32 %v945_v2, %v1753_v20 }
 0x2ce   :  { %1283 = vpush %v720_v7  ;;  %v937_v8 = vrot.slane %v936_v5, 2 }
 0x2cf   :  { %v947_v9 = vrot.slane %v946_v6, 2 }
 0x2d0   :  { %v938_v10 = vadd.f32 %v937_v8, %v936_v5 }
 0x2d1   :  { %v948_v11 = vadd.f32 %v947_v9, %v946_v6 }
 0x2d2   :  { %v939_v21 = vrot.slane %v938_v10, 1 }
 0x2d4   :  { %v940_v29 = vadd.f32 %v939_v21, %v938_v10 }
 0x2fd   :  { %s1280_s29 = spop %1279 }
 0x2fe   :  { %s616_s30 = smul.f32 %s1280_s29, %s615_s28  ;;  %s1282_s11 = spop %1281 }
 0x2ff   :  { %s1765_s12 = smul.f32 0.00040064103, %s1282_s11  ;;  %s1284_s13 = spop %1283 }
 0x300   :  { %s618_s14 = smul.f32 %s616_s30, %s1747_s24  ;;  %v1768_v19 = vstv %s616_s30  ;;  %s1268_s29 = sld [smem:[#allocation8 + $0x1]] }
 0x301   :  { %s724_s15 = smul.f32 %s1765_s12, %s1765_s12  ;;  %v621_v34 = vmul.f32 %v1768_v19, %v1561_v12  ;;  %v623_v36 = vmul.f32 %v1768_v19, %v1589_v18  ;;  %v822_v18 = vrot.slane %v821_v42, 2  ;;  %s1269_s30 = sld [smem:[#allocation9 + $0x1]] }
 0x302   :  { %s619_s2 = ssub.f32 %s617_s0, %s618_s14  ;;  %s723_s16 = smul.f32 0.00040064103, %s1284_s13 }
 0x303   :  { %v823_v57 = vadd.f32 %v822_v18, %v821_v42  ;;  %s1270_s13 = sld [smem:[#allocation8 + $0x2]] }
 0x304   :  { %v1778_v38 = vstv %s619_s2  ;;  %s725_s17 = ssub.f32 %s723_s16, %s724_s15 }
 0x305   :  { %v626_v39 = vadd.f32 %v1778_v38, %v621_v34  ;;  %v628_v40 = vadd.f32 %v1778_v38, %v623_v36  ;;  %v824_v60 = vrot.slane %v823_v57, 1  ;;  %v750_v34 = vpop.permute.xlu1 %749  ;;  %s1271_s15 = sld [smem:[#allocation9 + $0x2]] }
 0x306   :  { %s726_s18 = sadd.f32 1e-05, %s725_s17 }
 0x307   :  { %v664_v46 = vmul.f32 %v658_v27, %v626_v39  ;;  %v674_v47 = vmul.f32 %v668_v44, %v628_v40  ;;  %v642_v49 = vmul.f32 %v635_v41, %v626_v39  ;;  %v652_v12 = vmul.f32 %v646_v24, %v628_v40 }
 0x308   :  { %v727_v48 = vstv %s726_s18  ;;  %v825_v63 = vadd.f32 %v824_v60, %v823_v57  ;;  %v949_v24 = vrot.slane %v948_v11, 1  ;;  %s1272_s18 = sld [smem:[#allocation8 + $0x3]] }
 0x309   :  { %1359 = vrsqrt.f32 %v727_v48  ;;  %v676_v50 = vadd.f32 %v674_v47, %v664_v46  ;;  %v654_v52 = vadd.f32 %v652_v12, %v642_v49  ;;  %v773_v20 = vpop.permute.xlu1 %772  ;;  %v622_v46 = vmul.f32 %v1768_v19, %v1573_v14  ;;  %v761_v49 = vpop.permute.xlu0 %760 }
 0x30a   :  { %v950_v32 = vadd.f32 %v949_v24, %v948_v11  ;;  %v624_v47 = vmul.f32 %v1768_v19, %v1616_v30 }
 0x30b   :  { %v680_v54 = vmul.f32 %v676_v50, %v676_v50  ;;  %v678_v55 = vmul.f32 %v654_v52, %v654_v52  ;;  %v627_v48 = vadd.f32 %v1778_v38, %v622_v46 }
 0x30c   :  { %v629_v12 = vadd.f32 %v1778_v38, %v624_v47 }
 0x30d   :  { %v1782_v56 = vadd.f32 %v680_v54, %v678_v55  ;;  %v783_v17 = vpop.permute.xlu1 %782  ;;  %v643_v53 = vmul.f32 %v1759_v22, %v627_v48  ;;  %v665_v54 = vmul.f32 %v1770_v31, %v627_v48  ;;  %v755_v58 = vpop.permute.xlu0 %754 }
 0x30e   :  { %v653_v30 = vmul.f32 %v1763_v25, %v629_v12  ;;  %v675_v19 = vmul.f32 %v672_v33, %v629_v12 }
 0x30f   :  { %vm686_vm3 = vcmp.eq.f32.partialorder %v1782_v56, inf  ;;  %vm688_vm5 = vcmp.eq.f32.partialorder %v1782_v56, 0.0 }
 0x310   :  { %v655_v61 = vadd.f32 %v653_v30, %v643_v53 }
 0x311   :  { %v765_v39 = vpop.permute.xlu1 %764 }
 0x312   :  { %v679_v9 = vmul.f32 %v655_v61, %v655_v61 }
 0x315   :  { %v777_v40 = vpop.permute.xlu1 %776 }
 0x316   :  { %v1360_v62 = vpop.eup %1359 }
 0x317   :  { %1285 = vpush %v1360_v62  ;;  %v677_v62 = vadd.f32 %v675_v19, %v665_v54 }
 0x318   :  { %1287 = vpush %v825_v63 }
 0x319   :  { %1289 = vpush %v835_v0  ;;  %v865_v42 = vpop.permute.xlu1 %864  ;;  %v681_v10 = vmul.f32 %v677_v62, %v677_v62 }
 0x31d   :  { %v876_v44 = vpop.permute.xlu1 %875 }
 0x321   :  { %v898_v45 = vpop.permute.xlu1 %897 }
 0x325   :  { %v1804_v18 = vpop.permute.xlu1 %869 }
 0x329   :  { %v892_v38 = vpop.permute.xlu1 %891 }
 0x32d   :  { %v902_v24 = vpop.permute.xlu1 %901 }
 0x331   :  { %v1818_v46 = vpop.permute.xlu1 %990 }
 0x335   :  { %v1003_v54 = vpop.permute.xlu1 %1002 }
 0x348   :  { %s1784_s19 = spop %1285 }
 0x349   :  { %s1288_s20 = spop %1287  ;;  %s731_s11 = smul.f32 %s1784_s19, %s1268_s29 }
 0x34a   :  { %s1786_s21 = smul.f32 0.00040064103, %s1288_s20  ;;  %s1290_s9 = spop %1289 }
 0x34b   :  { %s838_s23 = smul.f32 0.00040064103, %s1290_s9  ;;  %v735_v50 = vstv %s731_s11  ;;  %s1273_s19 = sld [smem:[#allocation9 + $0x3]] }
 0x34c   :  { %s839_s22 = smul.f32 %s1786_s21, %s1786_s21  ;;  %v736_v14 = vmul.f32 %v735_v50, %v1567_v13  ;;  %v738_v55 = vmul.f32 %v735_v50, %v1603_v23  ;;  %v737_v22 = vmul.f32 %v735_v50, %v1579_v15  ;;  %v739_v13 = vmul.f32 %v735_v50, %v1632_v37  ;;  %v787_v23 = vpop.permute.xlu0 %786 }
 0x34d   :  { %s733_s14 = smul.f32 %s731_s11, %s1765_s12 }
 0x34e   :  { %s840_s5 = ssub.f32 %s838_s23, %s839_s22 }
 0x34f   :  { %s734_s2 = ssub.f32 %s1269_s30, %s733_s14 }
 0x350   :  { %s841_s3 = sadd.f32 1e-05, %s840_s5 }
 0x351   :  { %v740_v52 = vstv %s734_s2 }
 0x352   :  { %v842_v7 = vstv %s841_s3  ;;  %v741_v57 = vadd.f32 %v740_v52, %v736_v14  ;;  %v743_v60 = vadd.f32 %v740_v52, %v738_v55  ;;  %v742_v5 = vadd.f32 %v740_v52, %v737_v22  ;;  %v985_v22 = vpop.permute.xlu1 %984 }
 0x353   :  { %1361 = vrsqrt.f32 %v842_v7  ;;  %v744_v6 = vadd.f32 %v740_v52, %v739_v13 }
 0x354   :  { %v757_v0 = vmul.f32 %v750_v34, %v741_v57  ;;  %v767_v1 = vmul.f32 %v761_v49, %v743_v60  ;;  %v779_v31 = vmul.f32 %v773_v20, %v741_v57  ;;  %v789_v2 = vmul.f32 %v783_v17, %v743_v60  ;;  %v888_v34 = vpop.permute.xlu0 %887 }
 0x355   :  { %v768_v37 = vmul.f32 %v765_v39, %v744_v6  ;;  %v780_v33 = vmul.f32 %v777_v40, %v742_v5  ;;  %v1816_v20 = vadd.f32 %v681_v10, %v679_v9 }
 0x356   :  { %v791_v15 = vadd.f32 %v789_v2, %v779_v31 }
 0x357   :  { %vm693_vm4 = vcmp.eq.f32.partialorder %v1816_v20, inf  ;;  %vm695_vm6 = vcmp.eq.f32.partialorder %v1816_v20, 0.0 }
 0x358   :  { %v795_v47 = vmul.f32 %v791_v15, %v791_v15 }
 0x360   :  { %v1362_v27 = vpop.eup %1361 }
 0x361   :  { %1291 = vpush %v1362_v27  ;;  %v769_v27 = vadd.f32 %v767_v1, %v757_v0 }
 0x362   :  { %1293 = vpush %v940_v29  ;;  %v758_v29 = vmul.f32 %v755_v58, %v742_v5  ;;  %v75_v58 = vlaneseq }
 0x363   :  { %1295 = vpush %v950_v32  ;;  %v790_v32 = vmul.f32 %v787_v23, %v744_v6 }
 0x364   :  { %v770_v12 = vadd.f32 %v768_v37, %v758_v29 }
 0x365   :  { %v792_v50 = vadd.f32 %v790_v32, %v780_v33 }
 0x367   :  { %v796_v14 = vmul.f32 %v792_v50, %v792_v50 }
 0x392   :  { %s1292_s24 = spop %1291 }
 0x393   :  { %s1294_s25 = spop %1293  ;;  %s846_s16 = smul.f32 %s1292_s24, %s1270_s13 }
 0x394   :  { %s1792_s26 = smul.f32 0.00040064103, %s1294_s25  ;;  %s1296_s27 = spop %1295 }
 0x395   :  { %s953_s6 = smul.f32 0.00040064103, %s1296_s27  ;;  %v850_v63 = vstv %s846_s16 }
 0x396   :  { %s954_s1 = smul.f32 %s1792_s26, %s1792_s26  ;;  %v853_v7 = vmul.f32 %v850_v63, %v1669_v59  ;;  %v851_v8 = vmul.f32 %v850_v63, %v1614_v28  ;;  %v793_v28 = vmul.f32 %v769_v27, %v769_v27  ;;  %v852_v48 = vmul.f32 %v850_v63, %v1647_v43 }
 0x397   :  { %s848_s12 = smul.f32 %s846_s16, %s1786_s21  ;;  %v854_v49 = vmul.f32 %v850_v63, %v1687_v16 }
 0x398   :  { %s955_s28 = ssub.f32 %s953_s6, %s954_s1 }
 0x399   :  { %s849_s17 = ssub.f32 %s1271_s15, %s848_s12 }
 0x39a   :  { %s956_s0 = sadd.f32 1e-05, %s955_s28 }
 0x39b   :  { %v855_v25 = vstv %s849_s17 }
 0x39c   :  { %v957_v36 = vstv %s956_s0  ;;  %v856_v11 = vadd.f32 %v855_v25, %v851_v8  ;;  %v858_v21 = vadd.f32 %v855_v25, %v853_v7  ;;  %v857_v39 = vadd.f32 %v855_v25, %v852_v48 }
 0x39d   :  { %1363 = vrsqrt.f32 %v957_v36  ;;  %v859_v52 = vadd.f32 %v855_v25, %v854_v49  ;;  %v995_v25 = vpop.permute.xlu1 %994 }
 0x39e   :  { %v872_v17 = vmul.f32 %v865_v42, %v856_v11  ;;  %v882_v36 = vmul.f32 %v876_v44, %v858_v21  ;;  %v904_v59 = vmul.f32 %v898_v45, %v858_v21  ;;  %1365 = vrsqrt.f32 %v1782_v56  ;;  %v880_v42 = vpop.permute.xlu0 %879 }
 0x39f   :  { %1367 = vrsqrt.f32 %v1816_v20  ;;  %v1824_v44 = vadd.f32 %v795_v47, %v793_v28  ;;  %v794_v45 = vmul.f32 %v770_v12, %v770_v12  ;;  %v873_v43 = vmul.f32 %v1804_v18, %v857_v39 }
 0x3a0   :  { %v884_v40 = vadd.f32 %v882_v36, %v872_v17  ;;  %v895_v30 = vmul.f32 %v892_v38, %v857_v39  ;;  %v883_v16 = vmul.f32 %v880_v42, %v859_v52  ;;  %v905_v19 = vmul.f32 %v902_v24, %v859_v52 }
 0x3a1   :  { %1369 = vrsqrt.f32 %v1824_v44  ;;  %v1828_v60 = vadd.f32 %v796_v14, %v794_v45  ;;  %v76_v18 = vand.u32 127, %v75_v58  ;;  %v1017_v33 = vpop.permute.xlu1 %1016  ;;  %v696_v12 = vand.u32 2147483648, %v1816_v20 }
 0x3a2   :  { %v908_v55 = vmul.f32 %v884_v40, %v884_v40  ;;  %v885_v61 = vadd.f32 %v883_v16, %v873_v43  ;;  %v907_v62 = vadd.f32 %v905_v19, %v895_v30  ;;  %v980_v0 = vpop.permute.xlu0 %979  ;;  %vm801_vm7 = vcmp.eq.f32.partialorder %v1824_v44, inf }
 0x3a3   :  { %1371 = vrsqrt.f32 %v1828_v60  ;;  %vm77_vm2 = vcmp.lt.s32.totalorder %v76_v18, 78  ;;  %v804_v16 = vand.u32 2147483648, %v1824_v44  ;;  %vm803_vm8 = vcmp.eq.f32.partialorder %v1824_v44, 0.0 }
 0x3a4   :  { %v909_v38 = vmul.f32 %v885_v61, %v885_v61  ;;  %v911_v13 = vmul.f32 %v907_v62, %v907_v62  ;;  %v1840_v8 = vsel %vm77_vm2, 1.0, %v1446_v4  ;;  %vm808_vm9 = vcmp.eq.f32.partialorder %v1828_v60, inf }
 0x3a5   :  { %v811_v18 = vand.u32 2147483648, %v1828_v60  ;;  %vm810_vm11 = vcmp.eq.f32.partialorder %v1828_v60, 0.0 }
 0x3a6   :  { %v1013_v2 = vpop.permute.xlu0 %1012  ;;  %v1834_v5 = vadd.f32 %v911_v13, %v909_v38 }
 0x3a8   :  { %vm923_vm13 = vcmp.eq.f32.partialorder %v1834_v5, inf  ;;  %vm925_vm14 = vcmp.eq.f32.partialorder %v1834_v5, 0.0 }
 0x3aa   :  { %v1364_v41 = vpop.eup %1363  ;;  %v1007_v32 = vpop.permute.xlu0 %1006 }
 0x3ab   :  { %1297 = vpush %v1364_v41  ;;  %v894_v41 = vmul.f32 %v888_v34, %v856_v11  ;;  %v1366_v1 = vpop.eup %1365 }
 0x3ac   :  { %v1368_v31 = vpop.eup %1367  ;;  %v685_v23 = vmul.f32 %v1366_v1, %v1782_v56 }
 0x3ad   :  { %v906_v53 = vadd.f32 %v904_v59, %v894_v41  ;;  %v692_v7 = vmul.f32 %v1368_v31, %v1816_v20 }
 0x3ae   :  { %v1370_v9 = vpop.eup %1369 }
 0x3af   :  { %v910_v57 = vmul.f32 %v906_v53, %v906_v53 }
 0x3b0   :  { %v1372_v49 = vpop.eup %1371 }
 0x3b1   :  { %v1830_v63 = vadd.f32 %v910_v57, %v908_v55 }
 0x3b3   :  { %1373 = vrsqrt.f32 %v1830_v63  ;;  %vm916_vm10 = vcmp.eq.f32.partialorder %v1830_v63, inf  ;;  %v919_v38 = vand.u32 2147483648, %v1830_v63  ;;  %vm918_vm12 = vcmp.eq.f32.partialorder %v1830_v63, 0.0 }
 0x3b4   :  { %1375 = vrsqrt.f32 %v1834_v5 }
 0x3c0   :  { %v1374_v39 = vpop.eup %1373 }
 0x3c1   :  { %v1376_v62 = vpop.eup %1375 }
 0x3dc   :  { %s1298_s20 = spop %1297 }
 0x3dd   :  { %s961_s21 = smul.f32 %s1298_s20, %s1272_s18 }
 0x3df   :  { %s963_s9 = smul.f32 %s961_s21, %s1792_s26  ;;  %v965_v6 = vstv %s961_s21 }
 0x3e0   :  { %v968_v10 = vmul.f32 %v965_v6, %v1678_v3  ;;  %v966_v11 = vmul.f32 %v965_v6, %v1630_v35  ;;  %v967_v21 = vmul.f32 %v965_v6, %v1659_v51  ;;  %v969_v24 = vmul.f32 %v965_v6, %v1696_v26 }
 0x3e1   :  { %s964_s22 = ssub.f32 %s1273_s19, %s963_s9  ;;  %v689_v3 = vand.u32 2147483648, %v1782_v56  ;;  %v800_v35 = vmul.f32 %v1370_v9, %v1824_v44  ;;  %v687_v51 = vsel %vm686_vm3, %v1782_v56, %v685_v23  ;;  %v694_v26 = vsel %vm693_vm4, %v1816_v20, %v692_v7 }
 0x3e2   :  { %v697_v45 = vsel %vm695_vm6, %v696_v12, %v694_v26  ;;  %v807_v56 = vmul.f32 %v1372_v49, %v1828_v60  ;;  %v915_v20 = vmul.f32 %v1374_v39, %v1830_v63  ;;  %vm1127_vm3 = vcmask 261120  }
 0x3e3   :  { %v970_v27 = vstv %s964_s22  ;;  %v690_v42 = vsel %vm688_vm5, %v689_v3, %v687_v51  ;;  %v802_v14 = vsel %vm801_vm7, %v1824_v44, %v800_v35  ;;  %v1867_v61 = vmul.f32 %v1840_v8, %v697_v45 }
 0x3e4   :  { %v971_v15 = vadd.f32 %v970_v27, %v966_v11  ;;  %v973_v29 = vadd.f32 %v970_v27, %v968_v10  ;;  %v972_v4 = vadd.f32 %v970_v27, %v967_v21  ;;  %v974_v37 = vadd.f32 %v970_v27, %v969_v24 }
 0x3e5   :  { %v805_v57 = vsel %vm803_vm8, %v804_v16, %v802_v14  ;;  %v1864_v58 = vmul.f32 %v1840_v8, %v690_v42  ;;  %v809_v44 = vsel %vm808_vm9, %v1828_v60, %v807_v56  ;;  %v1072_v1 = vmul.f32 %v1867_v61, %v1867_v61 }
 0x3e6   :  { %v987_v34 = vmul.f32 %v980_v0, %v971_v15  ;;  %v997_v17 = vmul.f32 %v1818_v46, %v973_v29  ;;  %v988_v36 = vmul.f32 %v985_v22, %v972_v4  ;;  %v1009_v41 = vmul.f32 %v1003_v54, %v971_v15 }
 0x3e7   :  { %v1019_v59 = vmul.f32 %v1013_v2, %v973_v29  ;;  %v998_v28 = vmul.f32 %v995_v25, %v974_v37  ;;  %v1010_v47 = vmul.f32 %v1007_v32, %v972_v4  ;;  %v1020_v48 = vmul.f32 %v1017_v33, %v974_v37 }
 0x3e8   :  { %v999_v50 = vadd.f32 %v997_v17, %v987_v34  ;;  %v1873_v0 = vmul.f32 %v1840_v8, %v805_v57  ;;  %v917_v22 = vsel %vm916_vm10, %v1830_v63, %v915_v20  ;;  %v1071_v13 = vmul.f32 %v1864_v58, %v1864_v58 }
 0x3e9   :  { %v1021_v52 = vadd.f32 %v1019_v59, %v1009_v41  ;;  %v1000_v40 = vadd.f32 %v998_v28, %v988_v36  ;;  %v1022_v53 = vadd.f32 %v1020_v48, %v1010_v47  ;;  %v812_v31 = vsel %vm810_vm11, %v811_v18, %v809_v44 }
 0x3ea   :  { %v1023_v46 = vmul.f32 %v999_v50, %v999_v50  ;;  %v920_v2 = vsel %vm918_vm12, %v919_v38, %v917_v22  ;;  %v922_v25 = vmul.f32 %v1376_v62, %v1834_v5  ;;  %v1073_v6 = vmul.f32 %v1873_v0, %v1873_v0 }
 0x3eb   :  { %v1025_v54 = vmul.f32 %v1021_v52, %v1021_v52  ;;  %v1024_v43 = vmul.f32 %v1000_v40, %v1000_v40  ;;  %v1026_v30 = vmul.f32 %v1022_v53, %v1022_v53  ;;  %v1055_v23 = vadd.f32 %v1867_v61, %v1864_v58 }
 0x3ec   :  { %v1890_v60 = vmul.f32 %v1840_v8, %v812_v31  ;;  %v1894_v63 = vmul.f32 %v1840_v8, %v920_v2  ;;  %v1079_v7 = vadd.f32 %v1072_v1, %v1071_v13  ;;  %v924_v9 = vsel %vm923_vm13, %v1834_v5, %v922_v25 }
 0x3ed   :  { %v1027_v19 = vadd.f32 %v1025_v54, %v1023_v46  ;;  %v1028_v55 = vadd.f32 %v1026_v30, %v1024_v43  ;;  %v1056_v10 = vadd.f32 %v1055_v23, %v1873_v0  ;;  %v926_v11 = vand.u32 2147483648, %v1834_v5 }
 0x3ee   :  { %v1080_v21 = vadd.f32 %v1079_v7, %v1073_v6  ;;  %v1074_v27 = vmul.f32 %v1890_v60, %v1890_v60  ;;  %v1075_v15 = vmul.f32 %v1894_v63, %v1894_v63  ;;  %vm1202_vm4 = vcmask 1042432  }
 0x3ef   :  { %1377 = vrsqrt.f32 %v1027_v19  ;;  %v927_v24 = vsel %vm925_vm14, %v926_v11, %v924_v9  ;;  %v1057_v29 = vadd.f32 %v1056_v10, %v1890_v60  ;;  %vm1031_vm15 = vcmp.eq.f32.partialorder %v1027_v19, inf }
 0x3f0   :  { %1379 = vrsqrt.f32 %v1028_v55  ;;  %v1081_v37 = vadd.f32 %v1080_v21, %v1074_v27  ;;  %v1906_v33 = vmul.f32 %v1840_v8, %v927_v24  ;;  %v1034_v5 = vand.u32 2147483648, %v1027_v19 }
 0x3f1   :  { %v1058_v35 = vadd.f32 %v1057_v29, %v1894_v63  ;;  %vm1033_vm0 = vcmp.eq.f32.partialorder %v1027_v19, 0.0  ;;  %vm1038_vm1 = vcmp.eq.f32.partialorder %v1028_v55, inf  ;;  %v1041_v17 = vand.u32 2147483648, %v1028_v55 }
 0x3f2   :  { %v1082_v26 = vadd.f32 %v1081_v37, %v1075_v15  ;;  %vm1040_vm2 = vcmp.eq.f32.partialorder %v1028_v55, 0.0  ;;  %v1076_v48 = vmul.f32 %v1906_v33, %v1906_v33 }
 0x3f3   :  { %v1059_v47 = vadd.f32 %v1058_v35, %v1906_v33 }
 0x3f4   :  { %v1083_v39 = vadd.f32 %v1082_v26, %v1076_v48 }
 0x3fc   :  { %v1378_v4 = vpop.eup %1377 }
 0x3fd   :  { %v1380_v32 = vpop.eup %1379  ;;  %v1030_v3 = vmul.f32 %v1378_v4, %v1027_v19 }
 0x3fe   :  { %v1037_v51 = vmul.f32 %v1380_v32, %v1028_v55 }
 0x3ff   :  { %v1032_v34 = vsel %vm1031_vm15, %v1027_v19, %v1030_v3 }
 0x400   :  { %v1035_v36 = vsel %vm1033_vm0, %v1034_v5, %v1032_v34  ;;  %v1039_v41 = vsel %vm1038_vm1, %v1028_v55, %v1037_v51 }
 0x401   :  { %v1042_v59 = vsel %vm1040_vm2, %v1041_v17, %v1039_v41  ;;  %v1043_v28 = vmul.f32 %v1840_v8, %v1035_v36 }
 0x402   :  { %v1044_v49 = vmul.f32 %v1840_v8, %v1042_v59 }
 0x403   :  { %v1060_v12 = vadd.f32 %v1059_v47, %v1043_v28  ;;  %v1077_v50 = vmul.f32 %v1043_v28, %v1043_v28 }
 0x404   :  { %v1078_v40 = vmul.f32 %v1044_v49, %v1044_v49 }
 0x405   :  { %v1061_v52 = vadd.f32 %v1060_v12, %v1044_v49  ;;  %v1084_v53 = vadd.f32 %v1083_v39, %v1077_v50 }
 0x407   :  { %1062 = vadd.xlane.f32.xlu1 %v1061_v52  ;;  %v1085_v46 = vadd.f32 %v1084_v53, %v1078_v40 }
 0x409   :  { %1086 = vadd.xlane.f32.xlu0 %v1085_v46 }
 0x490   :  { %v1063_v42 = vpop.xlane.xlu1 %1062 }
 0x491   :  { %v1064_v45 = vrot.slane %v1063_v42, 4 }
 0x492   :  { %v1087_v14 = vpop.xlane.xlu0 %1086 }
 0x493   :  { %v1065_v54 = vadd.f32 %v1064_v45, %v1063_v42  ;;  %v1088_v43 = vrot.slane %v1087_v14, 4 }
 0x495   :  { %v1066_v30 = vrot.slane %v1065_v54, 2  ;;  %v1089_v16 = vadd.f32 %v1088_v43, %v1087_v14 }
 0x497   :  { %v1067_v56 = vadd.f32 %v1066_v30, %v1065_v54  ;;  %v1090_v20 = vrot.slane %v1089_v16, 2 }
 0x499   :  { %v1091_v19 = vadd.f32 %v1090_v20, %v1089_v16  ;;  %v1068_v8 = vrot.slane %v1067_v56, 1 }
 0x49b   :  { %v1069_v55 = vadd.f32 %v1068_v8, %v1067_v56  ;;  %v1092_v57 = vrot.slane %v1091_v19, 1 }
 0x49d   :  { %1299 = vpush %v1069_v55  ;;  %v1093_v62 = vadd.f32 %v1092_v57, %v1091_v19 }
 0x49f   :  { %1301 = vpush %v1093_v62 }
 0x4ce   :  { %s1300_s23 = spop %1299 }
 0x4cf   :  { %s1095_s5 = smul.f32 0.00020032052, %s1300_s23 }
 0x4d0   :  { %s1302_s3 = spop %1301 }
 0x4d1   :  { %s1097_s24 = smul.f32 %s1095_s5, %s1095_s5 }
 0x4d2   :  { %s1096_s25 = smul.f32 0.00020032052, %s1302_s3 }
 0x4d4   :  { %s1098_s26 = ssub.f32 %s1096_s25, %s1097_s24 }
 0x4d6   :  { %s1099_s27 = sadd.f32 1e-05, %s1098_s26 }
 0x4d8   :  { %v1100_v44 = vstv %s1099_s27 }
 0x4d9   :  { %1381 = vrsqrt.f32 %v1100_v44 }
 0x4e6   :  { %v1382_v22 = vpop.eup %1381 }
 0x4e7   :  { %1303 = vpush %v1382_v22 }
 0x518   :  { %s1304_s1 = spop %1303 }
 0x519   :  { %s1104_s0 = smul.f32 %s1304_s1, %s1943_s7 }
 0x51b   :  { %s1106_s29 = smul.f32 %s1104_s0, %s1095_s5  ;;  %v1108_v18 = vstv %s1104_s0 }
 0x51c   :  { %v1116_v38 = vmul.f32 %v1108_v18, %v1044_v49  ;;  %v1115_v13 = vmul.f32 %v1108_v18, %v1043_v28  ;;  %v1114_v25 = vmul.f32 %v1108_v18, %v1906_v33  ;;  %v1113_v6 = vmul.f32 %v1108_v18, %v1894_v63 }
 0x51d   :  { %s1107_s13 = ssub.f32 %s1944_s8, %s1106_s29  ;;  %v1112_v7 = vmul.f32 %v1108_v18, %v1890_v60  ;;  %v1111_v10 = vmul.f32 %v1108_v18, %v1873_v0  ;;  %v1110_v21 = vmul.f32 %v1108_v18, %v1867_v61  ;;  %v1109_v27 = vmul.f32 %v1108_v18, %v1864_v58  ;;  %v1126_v60 = vld [vmem:[%s1940_s4] sm:$0x7] }
 0x51f   :  { %v1117_v1 = vstv %s1107_s13 }
 0x520   :  { %v1125_v31 = vadd.f32 %v1117_v1, %v1116_v38  ;;  %v1124_v2 = vadd.f32 %v1117_v1, %v1115_v13  ;;  %v1123_v23 = vadd.f32 %v1117_v1, %v1114_v25  ;;  %v1122_v9 = vadd.f32 %v1117_v1, %v1113_v6 }
 0x521   :  { %v1121_v11 = vadd.f32 %v1117_v1, %v1112_v7  ;;  %v1120_v24 = vadd.f32 %v1117_v1, %v1111_v10  ;;  %v1119_v15 = vadd.f32 %v1117_v1, %v1110_v21  ;;  %v1118_v63 = vadd.f32 %v1117_v1, %v1109_v27 }
 0x522   :  { %1155 = vmatprep.subr.mxu0 %v1125_v31 }
 0x523   :  { %1156 = vmatpush1.msra.mxu0 %v1124_v2 }
 0x524   :  { %1157 = vmatprep.subr.mxu0 %v1123_v23 }
 0x525   :  { %1158 = vmatpush1.msra.mxu0 %v1122_v9 }
 0x526   :  { %1159 = vmatprep.subr.mxu0 %v1121_v11 }
 0x527   :  { %1160 = vmatpush1.msra.mxu0 %v1120_v24 }
 0x528   :  { %1161 = vmatprep.subr.mxu0 %v1119_v15 }
 0x529   :  { %1162 = vmatpush1.msra.mxu0 %v1118_v63 }
 0x52a   :  { %1274 = vmatmul.mubr.msk.f32.vlgmr.msra.gmra.mxu0 %vm1127_vm3, %v1126_v60 }
 0x5ea   :  { %v1197_v0 = vpop.f32.mrf.mxu0 }
 0x5eb   :  { %v1203_v61 = vsel %vm1202_vm4, %v1197_v0, -inf }
 0x5ec   :  { %v1204_v29 = vrot.slane %v1203_v61, 4  ;;  %v1199_v4 = vpop.f32.mrf.mxu0 }
 0x5ed   :  { %v1210_v58 = vsel %vm1202_vm4, %v1199_v4, -inf }
 0x5ee   :  { %v1205_v37 = vmax.f32 %v1203_v61, %v1204_v29  ;;  %v1211_v32 = vrot.slane %v1210_v58, 4 }
 0x5f0   :  { %v1206_v33 = vrot.slane %v1205_v37, 2  ;;  %v1212_v3 = vmax.f32 %v1210_v58, %v1211_v32 }
 0x5f2   :  { %v1207_v35 = vmax.f32 %v1205_v37, %v1206_v33  ;;  %v1213_v5 = vrot.slane %v1212_v3, 2 }
 0x5f4   :  { %v1208_v51 = vrot.slane %v1207_v35, 1  ;;  %v1214_v26 = vmax.f32 %v1212_v3, %v1213_v5 }
 0x5f6   :  { %v1209_v34 = vmax.f32 %v1207_v35, %v1208_v51  ;;  %v1215_v17 = vrot.slane %v1214_v26, 1 }
 0x5f8   :  { %v1217_v36 = vsub.f32 %v1197_v0, %v1209_v34  ;;  %v1216_v41 = vmax.f32 %v1214_v26, %v1215_v17 }
 0x5fa   :  { %v1219_v59 = vmul.f32 1.442695, %v1217_v36  ;;  %v1218_v28 = vsub.f32 %v1199_v4, %v1216_v41 }
 0x5fc   :  { %1383 = vpow2.f32 %v1219_v59  ;;  %v1221_v47 = vmul.f32 1.442695, %v1218_v28 }
 0x5fe   :  { %1385 = vpow2.f32 %v1221_v47 }
 0x609   :  { %v1384_v48 = vpop.eup %1383 }
 0x60a   :  { %v1223_v49 = vsel %vm1202_vm4, %v1384_v48, 0.0 }
 0x60b   :  { %v1386_v12 = vpop.eup %1385  ;;  %v1224_v50 = vrot.slane %v1223_v49, 4 }
 0x60c   :  { %v1230_v39 = vsel %vm1202_vm4, %v1386_v12, 0.0 }
 0x60d   :  { %v1225_v52 = vadd.f32 %v1224_v50, %v1223_v49  ;;  %v1231_v40 = vrot.slane %v1230_v39, 4 }
 0x60f   :  { %v1226_v53 = vrot.slane %v1225_v52, 2  ;;  %v1232_v46 = vadd.f32 %v1231_v40, %v1230_v39 }
 0x611   :  { %v1227_v42 = vadd.f32 %v1226_v53, %v1225_v52  ;;  %v1233_v45 = vrot.slane %v1232_v46, 2 }
 0x613   :  { %v1228_v14 = vrot.slane %v1227_v42, 1  ;;  %v1234_v54 = vadd.f32 %v1233_v45, %v1232_v46 }
 0x615   :  { %v1229_v43 = vadd.f32 %v1228_v14, %v1227_v42  ;;  %v1235_v30 = vrot.slane %v1234_v54, 1 }
 0x617   :  { %1387 = vlog2.f32 %v1229_v43  ;;  %v1236_v16 = vadd.f32 %v1235_v30, %v1234_v54 }
 0x619   :  { %1389 = vlog2.f32 %v1236_v16 }
 0x624   :  { %v1388_v56 = vpop.eup %1387 }
 0x625   :  { %v1238_v20 = vmul.f32 0.6931472, %v1388_v56 }
 0x626   :  { %v1390_v19 = vpop.eup %1389 }
 0x627   :  { %v1240_v8 = vmul.f32 0.6931472, %v1390_v19  ;;  %v1241_v55 = vsub.f32 %v1217_v36, %v1238_v20 }
 0x629   :  { %v1242_v57 = vsub.f32 %v1218_v28, %v1240_v8 }
 0x62b   :  { %v1245_v62 = vcombine.low %v1241_v55, %v1242_v57 }
 0x62d   :  { %1247 = vst [vmem:[%s1946_s10] sm:$0x77] %v1245_v62 }
 0x62e   :  { %1256 = vsyncpa [#allocation6], 1 }
 0x62f   :  { %1257 = vsyncpa [#allocation7], 1 }
 0x630   :  { %1258 = vsyncpa [#allocation10], 1 }

</bundles_post_ra>
